<compile_context>
chip_gen: v7x
topology: tpu7x:2x2x1
jax: 0.10.0
libtpu: 0.0.40
codegen_flags: <defaults>
</compile_context>

<pallas_src>
from functools import partial

import jax
import jax.numpy as jnp
from jax import lax
from jax.experimental import pallas as pl
from jax.experimental.pallas import tpu as pltpu

_EPS = 1e-10
_SUB = 8        # sub-rows per sample (fills the 8-sublane vreg dimension)
_LANE = 128


def _cdiv(a, b):
    return -(-a // b)


def _round_up(a, b):
    return _cdiv(a, b) * b


def _emd_mse_kernel(params_ref, m_ref, t_ref, hist_ref, mse_ref, *,
                    rows, bins, group, coef, tile_l, chunk, tiles_per_split,
                    l_total, n_valid, need_mask):
    s = pl.program_id(0)          # "parallel" split (TensorCore on v7x)
    i = pl.program_id(1)          # "arbitrary" reduction over column tiles

    @pl.when(i == 0)
    def _init():
        hist_ref[...] = jnp.zeros_like(hist_ref)
        mse_ref[...] = jnp.zeros_like(mse_ref)

    n_groups = _cdiv(bins, group)
    rho = params_ref[bins]                                    # delta / bw^2
    anchors = [params_ref[g * group] for g in range(n_groups)]

    col_base = (s * tiles_per_split + i) * tile_l
    if need_mask:
        rowid = lax.broadcasted_iota(jnp.int32, (rows, 1), 0)
        flat_base = (rowid % _SUB) * l_total                  # (rows, 1)

    def slab_hist(x, validf):
        """x: (rows, cw) f32 -> (rows, bins) per-bin partial sums (pre q_j)."""
        cols = []
        for g in range(n_groups):
            a = g * group
            u = x - anchors[g]
            p = jnp.exp(coef * (u * u))                       # anchor Gaussian
            if validf is not None:
                p = p * validf                                # zero padded lanes
            r = jnp.minimum(jnp.exp(rho * u), jnp.float32(1e30))
            cols.append(jnp.sum(p, axis=-1, keepdims=True))
            for _ in range(1, min(group, bins - a)):
                p = p * r                                     # 1 VPU mul / extra bin
                cols.append(jnp.sum(p, axis=-1, keepdims=True))
        return jnp.concatenate(cols, axis=-1)                 # (rows, bins)

    hist_m = jnp.zeros((rows, bins), jnp.float32)
    hist_t = jnp.zeros((rows, bins), jnp.float32)
    mse_acc = jnp.zeros((rows, _LANE), jnp.float32)

    for c0 in range(0, tile_l, chunk):
        cw = min(chunk, tile_l - c0)
        xm = m_ref[:, c0:c0 + cw].astype(jnp.float32)
        xt = t_ref[:, c0:c0 + cw].astype(jnp.float32)

        # MSE partial (padding is identical in both tensors -> diff 0).
        d = xm - xt
        d2 = d * d
        for l0 in range(0, cw, _LANE):
            mse_acc = mse_acc + d2[:, l0:l0 + _LANE]

        if need_mask:
            gcol = col_base + c0 + lax.broadcasted_iota(jnp.int32, (1, cw), 1)
            validf = ((flat_base + gcol) < n_valid).astype(jnp.float32)
        else:
            validf = None

        hist_m = hist_m + slab_hist(xm, validf)
        hist_t = hist_t + slab_hist(xt, validf)

    # One accumulation of the resident output blocks per grid step.
    hist_ref[...] += jnp.concatenate([hist_m, hist_t], axis=0)[None]
    mse_ref[...] += mse_acc[None]


def earth_movers_mse_loss(mask, target, *, bins=25, p=1, do_root=True,
                          alpha=0.5, bandwidth=0.9, group=5,
                          tile_cols=2048, num_splits=2):
    """mask, target: (B, C, H, W) float arrays -> scalar f32 loss."""
    B = mask.shape[0]
    m2 = mask.reshape(B, -1)
    t2 = target.reshape(B, -1)
    N = m2.shape[1]
    rows = B * _SUB
    coef = -0.5 / float(bandwidth) ** 2

    # Global min/max + bin centers (cheap XLA reductions on the originals).
    min_val = jnp.minimum(jnp.min(m2), jnp.min(t2)).astype(jnp.float32)
    max_val = jnp.maximum(jnp.max(m2), jnp.max(t2)).astype(jnp.float32)
    centers = jnp.linspace(min_val, max_val, bins).astype(jnp.float32)
    delta = (max_val - min_val) / jnp.float32(bins - 1)
    rho = delta * jnp.float32(-2.0 * coef)                    # delta / bw^2
    params = jnp.concatenate([centers, rho.reshape(1)])       # SMEM payload

    # ---- lane-dense (B*8, L) layout with balanced 128-multiple tiling -------
    l0 = _round_up(_cdiv(N, _SUB), _LANE)
    budget = max(_LANE, ((2 << 20) // (rows * 4)) // _LANE * _LANE)
    tgt = max(_LANE, (min(int(tile_cols), budget) // _LANE) * _LANE)
    nt = _round_up(_cdiv(l0, tgt), num_splits)                # total column tiles
    tile_l = _round_up(_cdiv(l0, nt), _LANE)                  # balanced tile width
    l_total = nt * tile_l
    n_pad = _SUB * l_total
    tiles_per_split = nt // num_splits
    row_cap = max(_LANE, ((64 * 1024) // rows) // _LANE * _LANE)
    chunk = max(_LANE, min(512, tile_l, row_cap))
    need_mask = (n_pad != N)

    if need_mask:
        pad = n_pad - N
        m2 = jnp.pad(m2, ((0, 0), (0, pad)))
        t2 = jnp.pad(t2, ((0, 0), (0, pad)))
    mr = m2.reshape(rows, l_total)
    tr = t2.reshape(rows, l_total)

    kernel = partial(
        _emd_mse_kernel,
        rows=rows, bins=bins, group=group, coef=float(coef),
        tile_l=tile_l, chunk=chunk, tiles_per_split=tiles_per_split,
        l_total=l_total, n_valid=N, need_mask=need_mask)

    grid_spec = pltpu.PrefetchScalarGridSpec(
        num_scalar_prefetch=0,
        grid=(num_splits, tiles_per_split),
        in_specs=[
            pl.BlockSpec(memory_space=pltpu.MemorySpace.SMEM),          # params
            pl.BlockSpec((rows, tile_l),
                         lambda s, i: (0, s * tiles_per_split + i)),    # mask
            pl.BlockSpec((rows, tile_l),
                         lambda s, i: (0, s * tiles_per_split + i)),    # target
        ],
        out_specs=[
            pl.BlockSpec((1, 2 * rows, bins), lambda s, i: (s, 0, 0)),  # hist
            pl.BlockSpec((1, rows, _LANE), lambda s, i: (s, 0, 0)),     # mse
        ],
    )

    itemsize = jnp.dtype(mr.dtype).itemsize
    n_groups = _cdiv(bins, group)
    cost = pl.CostEstimate(
        flops=int(2 * rows * l_total * (3 * bins + 8)),
        transcendentals=int(2 * rows * l_total * 2 * n_groups),
        bytes_accessed=int(2 * rows * l_total * itemsize
                           + num_splits * (2 * rows * bins + rows * _LANE) * 4),
    )

    hist_parts, mse_parts = pl.pallas_call(
        kernel,
        out_shape=(
            jax.ShapeDtypeStruct((num_splits, 2 * rows, bins), jnp.float32),
            jax.ShapeDtypeStruct((num_splits, rows, _LANE), jnp.float32),
        ),
        grid_spec=grid_spec,
        compiler_params=pltpu.CompilerParams(
            dimension_semantics=("parallel", "arbitrary")),
        cost_estimate=cost,
    )(params, mr, tr)

    # ---- tiny (B, bins) epilogue (plain XLA) ---------------------------------
    hist = jnp.sum(hist_parts, axis=0)                        # (2*rows, bins)
    hist_m = hist[:rows].reshape(B, _SUB, bins).sum(axis=1)   # (B, bins)
    hist_t = hist[rows:].reshape(B, _SUB, bins).sum(axis=1)

    offs = (jnp.arange(bins) % group).astype(jnp.float32)
    qvec = jnp.exp(jnp.float32(coef) * (offs * delta) ** 2)   # fold per-bin scalars

    pdf_m = hist_m * qvec * (1.0 / N)
    pdf_t = hist_t * qvec * (1.0 / N)
    pdf_m = pdf_m / (jnp.sum(pdf_m, axis=-1, keepdims=True) + _EPS)
    pdf_t = pdf_t / (jnp.sum(pdf_t, axis=-1, keepdims=True) + _EPS)

    diff = jnp.cumsum(pdf_m, axis=-1) - jnp.cumsum(pdf_t, axis=-1)
    if p == 1:
        emd = jnp.mean(jnp.abs(diff))
    elif p == 2:
        emd = jnp.mean(diff * diff)
        if do_root:
            emd = jnp.sqrt(emd)
    else:
        emd_b = jnp.mean(jnp.abs(diff) ** p, axis=-1)
        if do_root:
            emd_b = emd_b ** (1.0 / p)
        emd = jnp.mean(emd_b)

    mse = jnp.sum(mse_parts) * (1.0 / (B * N))
    return (1.0 - alpha) * mse + alpha * 100000.0 * emd


def _reference(mask, target, *, bins=25, p=1, do_root=True, alpha=0.5,
               bandwidth=0.9):
    """Pure-JAX reference mirroring the PyTorch forward."""
    B = mask.shape[0]
    m = mask.reshape(B, -1).astype(jnp.float32)
    t = target.reshape(B, -1).astype(jnp.float32)
    mn = jnp.minimum(jnp.min(m), jnp.min(t))
    mx = jnp.maximum(jnp.max(m), jnp.max(t))
    centers = jnp.linspace(mn, mx, bins).astype(jnp.float32)

    def hist(x):
        resid = (x[:, :, None] - centers[None, None, :]) / bandwidth
        kern = jnp.exp(-0.5 * resid ** 2)
        pdf = jnp.mean(kern, axis=1)
        return pdf / (jnp.sum(pdf, axis=1, keepdims=True) + _EPS)

    mc = jnp.cumsum(hist(m), axis=-1)
    tc = jnp.cumsum(hist(t), axis=-1)
    if p == 1:
        emd = jnp.mean(jnp.abs(mc - tc))
    elif p == 2:
        emd = jnp.mean((mc - tc) ** 2)
        if do_root:
            emd = jnp.sqrt(emd)
    else:
        emd = jnp.mean(jnp.abs(mc - tc) ** p, axis=-1)
        if do_root:
            emd = emd ** (1.0 / p)
    emd = jnp.mean(emd)
    mse = jnp.mean((m - t) ** 2)
    return (1.0 - alpha) * mse + alpha * 100000.0 * emd


if __name__ == "__main__":
    key = jax.random.PRNGKey(0)
    k1, k2, k3, k4 = jax.random.split(key, 4)

    # Segmentation-style NCHW inputs; N = 4*16*16 = 1024.
    mask = jax.random.uniform(k1, (2, 4, 16, 16), dtype=jnp.float32)
    target = jax.random.uniform(k2, (2, 4, 16, 16), dtype=jnp.float32)
    loss = jax.block_until_ready(earth_movers_mse_loss(mask, target))
    ref = jax.block_until_ready(_reference(mask, target))
    assert jnp.isfinite(loss), loss
    assert jnp.allclose(loss, ref, rtol=1e-2, atol=5e-2), (loss, ref)

    # Ragged N (= 300) exercises the padding + per-row validity-mask path.
    mask2 = jax.random.uniform(k3, (2, 3, 10, 10), dtype=jnp.float32)
    target2 = jax.random.uniform(k4, (2, 3, 10, 10), dtype=jnp.float32)
    loss2 = jax.block_until_ready(earth_movers_mse_loss(mask2, target2))
    ref2 = jax.block_until_ready(_reference(mask2, target2))
    assert jnp.isfinite(loss2), loss2
    assert jnp.allclose(loss2, ref2, rtol=1e-2, atol=5e-2), (loss2, ref2)

    print("KERNEL_OK")
</pallas_src>

<mosaic_0001>
module attributes {stable_mosaic.version = 11 : i64} {
  func.func @_emd_mse_kernel(%arg0: i32, %arg1: i32, %arg2: memref<26xf32, #tpu.memory_space<smem>>, %arg3: memref<16x128xf32, #tpu.memory_space<vmem>>, %arg4: memref<16x128xf32, #tpu.memory_space<vmem>>, %arg5: memref<1x32x25xf32, #tpu.memory_space<vmem>>, %arg6: memref<1x16x128xf32, #tpu.memory_space<vmem>>) attributes {dimension_semantics = [#tpu.dimension_semantics<parallel>, #tpu.dimension_semantics<arbitrary>], iteration_bounds = array<i64: 2, 1>, scalar_prefetch = 0 : i64, scratch_operands = 0 : i64, tpu.core_type = #tpu.core_type<tc>, window_params = [{transform_indices = @transform_0, window_bounds = array<i64: 26>}, {transform_indices = @transform_1, window_bounds = array<i64: 16, 128>}, {transform_indices = @transform_2, window_bounds = array<i64: 16, 128>}, {transform_indices = @transform_3, window_bounds = array<i64: 1, 32, 25>}, {transform_indices = @transform_4, window_bounds = array<i64: 1, 16, 128>}]} {
    %c0_i32 = arith.constant 0 : i32
    %0 = arith.cmpi eq, %arg1, %c0_i32 : i32
    %1 = arith.extui %0 : i1 to i32
    %c0_i32_0 = arith.constant 0 : i32
    %2 = arith.cmpi ne, %1, %c0_i32_0 : i32
    scf.if %2 {
      %cst_95 = arith.constant 0.000000e+00 : f32
      %327 = vector.broadcast %cst_95 : f32 to vector<1x32x25xf32>
      %c0_96 = arith.constant 0 : index
      %c0_97 = arith.constant 0 : index
      %c0_98 = arith.constant 0 : index
      %328 = vector.load %arg5[%c0_96, %c0_97, %c0_98] : memref<1x32x25xf32, #tpu.memory_space<vmem>>, vector<1x32x25xf32>
      tpu.vector_store %arg5[%c0_96, %c0_97, %c0_98], %327 {strides = array<i32>} : memref<1x32x25xf32, #tpu.memory_space<vmem>>, vector<1x32x25xf32>,
      %cst_99 = arith.constant 0.000000e+00 : f32
      %329 = vector.broadcast %cst_99 : f32 to vector<1x16x128xf32>
      %c0_100 = arith.constant 0 : index
      %c0_101 = arith.constant 0 : index
      %c0_102 = arith.constant 0 : index
      %330 = vector.load %arg6[%c0_100, %c0_101, %c0_102] : memref<1x16x128xf32, #tpu.memory_space<vmem>>, vector<1x16x128xf32>
      tpu.vector_store %arg6[%c0_100, %c0_101, %c0_102], %329 {strides = array<i32>} : memref<1x16x128xf32, #tpu.memory_space<vmem>>, vector<1x16x128xf32>,
    } else {
    }
    %c25 = arith.constant 25 : index
    %3 = memref.load %arg2[%c25] : memref<26xf32, #tpu.memory_space<smem>>
    %c0 = arith.constant 0 : index
    %4 = memref.load %arg2[%c0] : memref<26xf32, #tpu.memory_space<smem>>
    %c5 = arith.constant 5 : index
    %5 = memref.load %arg2[%c5] : memref<26xf32, #tpu.memory_space<smem>>
    %c10 = arith.constant 10 : index
    %6 = memref.load %arg2[%c10] : memref<26xf32, #tpu.memory_space<smem>>
    %c15 = arith.constant 15 : index
    %7 = memref.load %arg2[%c15] : memref<26xf32, #tpu.memory_space<smem>>
    %c20 = arith.constant 20 : index
    %8 = memref.load %arg2[%c20] : memref<26xf32, #tpu.memory_space<smem>>
    %c1_i32 = arith.constant 1 : i32
    %9 = arith.muli %arg0, %c1_i32 : i32
    %10 = arith.addi %9, %arg1 : i32
    %c128_i32 = arith.constant 128 : i32
    %11 = arith.muli %10, %c128_i32 : i32
    %12 = tpu.iota {dimensions = array<i32: 0>} : vector<16x1xi32>
    %c8_i32 = arith.constant 8 : i32
    %c0_i32_1 = arith.constant 0 : i32
    %13 = arith.cmpi eq, %c8_i32, %c0_i32_1 : i32
    %c1_i32_2 = arith.constant 1 : i32
    %14 = arith.select %13, %c1_i32_2, %c8_i32 : i32
    %15 = vector.broadcast %14 : i32 to vector<16x1xi32>
    %16 = arith.remsi %12, %15 : vector<16x1xi32>
    %c0_i32_3 = arith.constant 0 : i32
    %17 = vector.broadcast %c0_i32_3 : i32 to vector<16x1xi32>
    %18 = arith.cmpi ne, %16, %17 : vector<16x1xi32>
    %c0_i32_4 = arith.constant 0 : i32
    %19 = vector.broadcast %c0_i32_4 : i32 to vector<16x1xi32>
    %20 = arith.cmpi slt, %16, %19 : vector<16x1xi32>
    %c0_i32_5 = arith.constant 0 : i32
    %21 = arith.cmpi slt, %14, %c0_i32_5 : i32
    %22 = vector.broadcast %21 : i1 to vector<16x1xi1>
    %23 = vector.broadcast %22 : vector<16x1xi1> to vector<16x1xi1>
    %24 = arith.xori %20, %23 : vector<16x1xi1>
    %25 = arith.andi %24, %18 : vector<16x1xi1>
    %26 = vector.broadcast %14 : i32 to vector<16x1xi32>
    %27 = arith.addi %16, %26 : vector<16x1xi32>
    %28 = arith.select %25, %27, %16 : vector<16x1xi1>, vector<16x1xi32>
    %c256_i32 = arith.constant 256 : i32
    %29 = vector.broadcast %c256_i32 : i32 to vector<16x1xi32>
    %30 = arith.muli %28, %29 : vector<16x1xi32>
    %cst = arith.constant 0.000000e+00 : f32
    %31 = vector.broadcast %cst : f32 to vector<16x25xf32>
    %cst_6 = arith.constant 0.000000e+00 : f32
    %32 = vector.broadcast %cst_6 : f32 to vector<16x25xf32>
    %cst_7 = arith.constant 0.000000e+00 : f32
    %33 = vector.broadcast %cst_7 : f32 to vector<16x128xf32>
    %c0_8 = arith.constant 0 : index
    %c0_9 = arith.constant 0 : index
    %34 = vector.load %arg3[%c0_8, %c0_9] : memref<16x128xf32, #tpu.memory_space<vmem>>, vector<16x128xf32>
    %c0_10 = arith.constant 0 : index
    %c0_11 = arith.constant 0 : index
    %35 = vector.load %arg4[%c0_10, %c0_11] : memref<16x128xf32, #tpu.memory_space<vmem>>, vector<16x128xf32>
    %36 = arith.subf %34, %35 : vector<16x128xf32>
    %37 = arith.mulf %36, %36 : vector<16x128xf32>
    %38 = arith.addf %33, %37 : vector<16x128xf32>
    %c0_i32_12 = arith.constant 0 : i32
    %39 = arith.addi %11, %c0_i32_12 : i32
    %40 = tpu.iota {dimensions = array<i32: 1>} : vector<1x128xi32>
    %41 = vector.broadcast %39 : i32 to vector<1x128xi32>
    %42 = arith.addi %41, %40 : vector<1x128xi32>
    %43 = vector.broadcast %30 : vector<16x1xi32> to vector<16x128xi32>
    %44 = vector.broadcast %42 : vector<1x128xi32> to vector<16x128xi32>
    %45 = arith.addi %43, %44 : vector<16x128xi32>
    %c1024_i32 = arith.constant 1024 : i32
    %46 = vector.broadcast %c1024_i32 : i32 to vector<16x128xi32>
    %47 = arith.cmpi slt, %45, %46 : vector<16x128xi32>
    %48 = arith.extui %47 : vector<16x128xi1> to vector<16x128xi32>
    %49 = arith.sitofp %48 : vector<16x128xi32> to vector<16x128xf32>
    %50 = vector.broadcast %4 : f32 to vector<16x128xf32>
    %51 = arith.subf %34, %50 : vector<16x128xf32>
    %52 = arith.mulf %51, %51 : vector<16x128xf32>
    %cst_13 = arith.constant -0.61728394 : f32
    %53 = vector.broadcast %cst_13 : f32 to vector<16x128xf32>
    %54 = arith.mulf %53, %52 : vector<16x128xf32>
    %55 = math.exp %54 : vector<16x128xf32>
    %56 = arith.mulf %55, %49 : vector<16x128xf32>
    %57 = vector.broadcast %3 : f32 to vector<16x128xf32>
    %58 = arith.mulf %57, %51 : vector<16x128xf32>
    %59 = math.exp %58 : vector<16x128xf32>
    %cst_14 = arith.constant 1.000000e+30 : f32
    %60 = vector.broadcast %cst_14 : f32 to vector<16x128xf32>
    %61 = arith.minimumf %59, %60 : vector<16x128xf32>
    %cst_15 = arith.constant dense<0.000000e+00> : vector<16xf32>
    %62 = vector.multi_reduction <add>, %56, %cst_15 [1] : vector<16x128xf32> to vector<16xf32>
    %63 = vector.shape_cast %62 : vector<16xf32> to vector<16x1xf32>
    %64 = arith.mulf %56, %61 : vector<16x128xf32>
    %cst_16 = arith.constant dense<0.000000e+00> : vector<16xf32>
    %65 = vector.multi_reduction <add>, %64, %cst_16 [1] : vector<16x128xf32> to vector<16xf32>
    %66 = vector.shape_cast %65 : vector<16xf32> to vector<16x1xf32>
    %67 = arith.mulf %64, %61 : vector<16x128xf32>
    %cst_17 = arith.constant dense<0.000000e+00> : vector<16xf32>
    %68 = vector.multi_reduction <add>, %67, %cst_17 [1] : vector<16x128xf32> to vector<16xf32>
    %69 = vector.shape_cast %68 : vector<16xf32> to vector<16x1xf32>
    %70 = arith.mulf %67, %61 : vector<16x128xf32>
    %cst_18 = arith.constant dense<0.000000e+00> : vector<16xf32>
    %71 = vector.multi_reduction <add>, %70, %cst_18 [1] : vector<16x128xf32> to vector<16xf32>
    %72 = vector.shape_cast %71 : vector<16xf32> to vector<16x1xf32>
    %73 = arith.mulf %70, %61 : vector<16x128xf32>
    %cst_19 = arith.constant dense<0.000000e+00> : vector<16xf32>
    %74 = vector.multi_reduction <add>, %73, %cst_19 [1] : vector<16x128xf32> to vector<16xf32>
    %75 = vector.shape_cast %74 : vector<16xf32> to vector<16x1xf32>
    %76 = vector.broadcast %5 : f32 to vector<16x128xf32>
    %77 = arith.subf %34, %76 : vector<16x128xf32>
    %78 = arith.mulf %77, %77 : vector<16x128xf32>
    %cst_20 = arith.constant -0.61728394 : f32
    %79 = vector.broadcast %cst_20 : f32 to vector<16x128xf32>
    %80 = arith.mulf %79, %78 : vector<16x128xf32>
    %81 = math.exp %80 : vector<16x128xf32>
    %82 = arith.mulf %81, %49 : vector<16x128xf32>
    %83 = vector.broadcast %3 : f32 to vector<16x128xf32>
    %84 = arith.mulf %83, %77 : vector<16x128xf32>
    %85 = math.exp %84 : vector<16x128xf32>
    %cst_21 = arith.constant 1.000000e+30 : f32
    %86 = vector.broadcast %cst_21 : f32 to vector<16x128xf32>
    %87 = arith.minimumf %85, %86 : vector<16x128xf32>
    %cst_22 = arith.constant dense<0.000000e+00> : vector<16xf32>
    %88 = vector.multi_reduction <add>, %82, %cst_22 [1] : vector<16x128xf32> to vector<16xf32>
    %89 = vector.shape_cast %88 : vector<16xf32> to vector<16x1xf32>
    %90 = arith.mulf %82, %87 : vector<16x128xf32>
    %cst_23 = arith.constant dense<0.000000e+00> : vector<16xf32>
    %91 = vector.multi_reduction <add>, %90, %cst_23 [1] : vector<16x128xf32> to vector<16xf32>
    %92 = vector.shape_cast %91 : vector<16xf32> to vector<16x1xf32>
    %93 = arith.mulf %90, %87 : vector<16x128xf32>
    %cst_24 = arith.constant dense<0.000000e+00> : vector<16xf32>
    %94 = vector.multi_reduction <add>, %93, %cst_24 [1] : vector<16x128xf32> to vector<16xf32>
    %95 = vector.shape_cast %94 : vector<16xf32> to vector<16x1xf32>
    %96 = arith.mulf %93, %87 : vector<16x128xf32>
    %cst_25 = arith.constant dense<0.000000e+00> : vector<16xf32>
    %97 = vector.multi_reduction <add>, %96, %cst_25 [1] : vector<16x128xf32> to vector<16xf32>
    %98 = vector.shape_cast %97 : vector<16xf32> to vector<16x1xf32>
    %99 = arith.mulf %96, %87 : vector<16x128xf32>
    %cst_26 = arith.constant dense<0.000000e+00> : vector<16xf32>
    %100 = vector.multi_reduction <add>, %99, %cst_26 [1] : vector<16x128xf32> to vector<16xf32>
    %101 = vector.shape_cast %100 : vector<16xf32> to vector<16x1xf32>
    %102 = vector.broadcast %6 : f32 to vector<16x128xf32>
    %103 = arith.subf %34, %102 : vector<16x128xf32>
    %104 = arith.mulf %103, %103 : vector<16x128xf32>
    %cst_27 = arith.constant -0.61728394 : f32
    %105 = vector.broadcast %cst_27 : f32 to vector<16x128xf32>
    %106 = arith.mulf %105, %104 : vector<16x128xf32>
    %107 = math.exp %106 : vector<16x128xf32>
    %108 = arith.mulf %107, %49 : vector<16x128xf32>
    %109 = vector.broadcast %3 : f32 to vector<16x128xf32>
    %110 = arith.mulf %109, %103 : vector<16x128xf32>
    %111 = math.exp %110 : vector<16x128xf32>
    %cst_28 = arith.constant 1.000000e+30 : f32
    %112 = vector.broadcast %cst_28 : f32 to vector<16x128xf32>
    %113 = arith.minimumf %111, %112 : vector<16x128xf32>
    %cst_29 = arith.constant dense<0.000000e+00> : vector<16xf32>
    %114 = vector.multi_reduction <add>, %108, %cst_29 [1] : vector<16x128xf32> to vector<16xf32>
    %115 = vector.shape_cast %114 : vector<16xf32> to vector<16x1xf32>
    %116 = arith.mulf %108, %113 : vector<16x128xf32>
    %cst_30 = arith.constant dense<0.000000e+00> : vector<16xf32>
    %117 = vector.multi_reduction <add>, %116, %cst_30 [1] : vector<16x128xf32> to vector<16xf32>
    %118 = vector.shape_cast %117 : vector<16xf32> to vector<16x1xf32>
    %119 = arith.mulf %116, %113 : vector<16x128xf32>
    %cst_31 = arith.constant dense<0.000000e+00> : vector<16xf32>
    %120 = vector.multi_reduction <add>, %119, %cst_31 [1] : vector<16x128xf32> to vector<16xf32>
    %121 = vector.shape_cast %120 : vector<16xf32> to vector<16x1xf32>
    %122 = arith.mulf %119, %113 : vector<16x128xf32>
    %cst_32 = arith.constant dense<0.000000e+00> : vector<16xf32>
    %123 = vector.multi_reduction <add>, %122, %cst_32 [1] : vector<16x128xf32> to vector<16xf32>
    %124 = vector.shape_cast %123 : vector<16xf32> to vector<16x1xf32>
    %125 = arith.mulf %122, %113 : vector<16x128xf32>
    %cst_33 = arith.constant dense<0.000000e+00> : vector<16xf32>
    %126 = vector.multi_reduction <add>, %125, %cst_33 [1] : vector<16x128xf32> to vector<16xf32>
    %127 = vector.shape_cast %126 : vector<16xf32> to vector<16x1xf32>
    %128 = vector.broadcast %7 : f32 to vector<16x128xf32>
    %129 = arith.subf %34, %128 : vector<16x128xf32>
    %130 = arith.mulf %129, %129 : vector<16x128xf32>
    %cst_34 = arith.constant -0.61728394 : f32
    %131 = vector.broadcast %cst_34 : f32 to vector<16x128xf32>
    %132 = arith.mulf %131, %130 : vector<16x128xf32>
    %133 = math.exp %132 : vector<16x128xf32>
    %134 = arith.mulf %133, %49 : vector<16x128xf32>
    %135 = vector.broadcast %3 : f32 to vector<16x128xf32>
    %136 = arith.mulf %135, %129 : vector<16x128xf32>
    %137 = math.exp %136 : vector<16x128xf32>
    %cst_35 = arith.constant 1.000000e+30 : f32
    %138 = vector.broadcast %cst_35 : f32 to vector<16x128xf32>
    %139 = arith.minimumf %137, %138 : vector<16x128xf32>
    %cst_36 = arith.constant dense<0.000000e+00> : vector<16xf32>
    %140 = vector.multi_reduction <add>, %134, %cst_36 [1] : vector<16x128xf32> to vector<16xf32>
    %141 = vector.shape_cast %140 : vector<16xf32> to vector<16x1xf32>
    %142 = arith.mulf %134, %139 : vector<16x128xf32>
    %cst_37 = arith.constant dense<0.000000e+00> : vector<16xf32>
    %143 = vector.multi_reduction <add>, %142, %cst_37 [1] : vector<16x128xf32> to vector<16xf32>
    %144 = vector.shape_cast %143 : vector<16xf32> to vector<16x1xf32>
    %145 = arith.mulf %142, %139 : vector<16x128xf32>
    %cst_38 = arith.constant dense<0.000000e+00> : vector<16xf32>
    %146 = vector.multi_reduction <add>, %145, %cst_38 [1] : vector<16x128xf32> to vector<16xf32>
    %147 = vector.shape_cast %146 : vector<16xf32> to vector<16x1xf32>
    %148 = arith.mulf %145, %139 : vector<16x128xf32>
    %cst_39 = arith.constant dense<0.000000e+00> : vector<16xf32>
    %149 = vector.multi_reduction <add>, %148, %cst_39 [1] : vector<16x128xf32> to vector<16xf32>
    %150 = vector.shape_cast %149 : vector<16xf32> to vector<16x1xf32>
    %151 = arith.mulf %148, %139 : vector<16x128xf32>
    %cst_40 = arith.constant dense<0.000000e+00> : vector<16xf32>
    %152 = vector.multi_reduction <add>, %151, %cst_40 [1] : vector<16x128xf32> to vector<16xf32>
    %153 = vector.shape_cast %152 : vector<16xf32> to vector<16x1xf32>
    %154 = vector.broadcast %8 : f32 to vector<16x128xf32>
    %155 = arith.subf %34, %154 : vector<16x128xf32>
    %156 = arith.mulf %155, %155 : vector<16x128xf32>
    %cst_41 = arith.constant -0.61728394 : f32
    %157 = vector.broadcast %cst_41 : f32 to vector<16x128xf32>
    %158 = arith.mulf %157, %156 : vector<16x128xf32>
    %159 = math.exp %158 : vector<16x128xf32>
    %160 = arith.mulf %159, %49 : vector<16x128xf32>
    %161 = vector.broadcast %3 : f32 to vector<16x128xf32>
    %162 = arith.mulf %161, %155 : vector<16x128xf32>
    %163 = math.exp %162 : vector<16x128xf32>
    %cst_42 = arith.constant 1.000000e+30 : f32
    %164 = vector.broadcast %cst_42 : f32 to vector<16x128xf32>
    %165 = arith.minimumf %163, %164 : vector<16x128xf32>
    %cst_43 = arith.constant dense<0.000000e+00> : vector<16xf32>
    %166 = vector.multi_reduction <add>, %160, %cst_43 [1] : vector<16x128xf32> to vector<16xf32>
    %167 = vector.shape_cast %166 : vector<16xf32> to vector<16x1xf32>
    %168 = arith.mulf %160, %165 : vector<16x128xf32>
    %cst_44 = arith.constant dense<0.000000e+00> : vector<16xf32>
    %169 = vector.multi_reduction <add>, %168, %cst_44 [1] : vector<16x128xf32> to vector<16xf32>
    %170 = vector.shape_cast %169 : vector<16xf32> to vector<16x1xf32>
    %171 = arith.mulf %168, %165 : vector<16x128xf32>
    %cst_45 = arith.constant dense<0.000000e+00> : vector<16xf32>
    %172 = vector.multi_reduction <add>, %171, %cst_45 [1] : vector<16x128xf32> to vector<16xf32>
    %173 = vector.shape_cast %172 : vector<16xf32> to vector<16x1xf32>
    %174 = arith.mulf %171, %165 : vector<16x128xf32>
    %cst_46 = arith.constant dense<0.000000e+00> : vector<16xf32>
    %175 = vector.multi_reduction <add>, %174, %cst_46 [1] : vector<16x128xf32> to vector<16xf32>
    %176 = vector.shape_cast %175 : vector<16xf32> to vector<16x1xf32>
    %177 = arith.mulf %174, %165 : vector<16x128xf32>
    %cst_47 = arith.constant dense<0.000000e+00> : vector<16xf32>
    %178 = vector.multi_reduction <add>, %177, %cst_47 [1] : vector<16x128xf32> to vector<16xf32>
    %179 = vector.shape_cast %178 : vector<16xf32> to vector<16x1xf32>
    %180 = tpu.concatenate %63, %66, %69, %72, %75, %89, %92, %95, %98, %101, %115, %118, %121, %124, %127, %141 in 1 : vector<16x1xf32>, vector<16x1xf32>, vector<16x1xf32>, vector<16x1xf32>, vector<16x1xf32>, vector<16x1xf32>, vector<16x1xf32>, vector<16x1xf32>, vector<16x1xf32>, vector<16x1xf32>, vector<16x1xf32>, vector<16x1xf32>, vector<16x1xf32>, vector<16x1xf32>, vector<16x1xf32>, vector<16x1xf32> -> vector<16x16xf32>
    %181 = tpu.concatenate %144, %147, %150, %153, %167, %170, %173, %176, %179 in 1 : vector<16x1xf32>, vector<16x1xf32>, vector<16x1xf32>, vector<16x1xf32>, vector<16x1xf32>, vector<16x1xf32>, vector<16x1xf32>, vector<16x1xf32>, vector<16x1xf32> -> vector<16x9xf32>
    %182 = tpu.concatenate %180, %181 in 1 : vector<16x16xf32>, vector<16x9xf32> -> vector<16x25xf32>
    %183 = arith.addf %31, %182 : vector<16x25xf32>
    %184 = vector.broadcast %4 : f32 to vector<16x128xf32>
    %185 = arith.subf %35, %184 : vector<16x128xf32>
    %186 = arith.mulf %185, %185 : vector<16x128xf32>
    %cst_48 = arith.constant -0.61728394 : f32
    %187 = vector.broadcast %cst_48 : f32 to vector<16x128xf32>
    %188 = arith.mulf %187, %186 : vector<16x128xf32>
    %189 = math.exp %188 : vector<16x128xf32>
    %190 = arith.mulf %189, %49 : vector<16x128xf32>
    %191 = vector.broadcast %3 : f32 to vector<16x128xf32>
    %192 = arith.mulf %191, %185 : vector<16x128xf32>
    %193 = math.exp %192 : vector<16x128xf32>
    %cst_49 = arith.constant 1.000000e+30 : f32
    %194 = vector.broadcast %cst_49 : f32 to vector<16x128xf32>
    %195 = arith.minimumf %193, %194 : vector<16x128xf32>
    %cst_50 = arith.constant dense<0.000000e+00> : vector<16xf32>
    %196 = vector.multi_reduction <add>, %190, %cst_50 [1] : vector<16x128xf32> to vector<16xf32>
    %197 = vector.shape_cast %196 : vector<16xf32> to vector<16x1xf32>
    %198 = arith.mulf %190, %195 : vector<16x128xf32>
    %cst_51 = arith.constant dense<0.000000e+00> : vector<16xf32>
    %199 = vector.multi_reduction <add>, %198, %cst_51 [1] : vector<16x128xf32> to vector<16xf32>
    %200 = vector.shape_cast %199 : vector<16xf32> to vector<16x1xf32>
    %201 = arith.mulf %198, %195 : vector<16x128xf32>
    %cst_52 = arith.constant dense<0.000000e+00> : vector<16xf32>
    %202 = vector.multi_reduction <add>, %201, %cst_52 [1] : vector<16x128xf32> to vector<16xf32>
    %203 = vector.shape_cast %202 : vector<16xf32> to vector<16x1xf32>
    %204 = arith.mulf %201, %195 : vector<16x128xf32>
    %cst_53 = arith.constant dense<0.000000e+00> : vector<16xf32>
    %205 = vector.multi_reduction <add>, %204, %cst_53 [1] : vector<16x128xf32> to vector<16xf32>
    %206 = vector.shape_cast %205 : vector<16xf32> to vector<16x1xf32>
    %207 = arith.mulf %204, %195 : vector<16x128xf32>
    %cst_54 = arith.constant dense<0.000000e+00> : vector<16xf32>
    %208 = vector.multi_reduction <add>, %207, %cst_54 [1] : vector<16x128xf32> to vector<16xf32>
    %209 = vector.shape_cast %208 : vector<16xf32> to vector<16x1xf32>
    %210 = vector.broadcast %5 : f32 to vector<16x128xf32>
    %211 = arith.subf %35, %210 : vector<16x128xf32>
    %212 = arith.mulf %211, %211 : vector<16x128xf32>
    %cst_55 = arith.constant -0.61728394 : f32
    %213 = vector.broadcast %cst_55 : f32 to vector<16x128xf32>
    %214 = arith.mulf %213, %212 : vector<16x128xf32>
    %215 = math.exp %214 : vector<16x128xf32>
    %216 = arith.mulf %215, %49 : vector<16x128xf32>
    %217 = vector.broadcast %3 : f32 to vector<16x128xf32>
    %218 = arith.mulf %217, %211 : vector<16x128xf32>
    %219 = math.exp %218 : vector<16x128xf32>
    %cst_56 = arith.constant 1.000000e+30 : f32
    %220 = vector.broadcast %cst_56 : f32 to vector<16x128xf32>
    %221 = arith.minimumf %219, %220 : vector<16x128xf32>
    %cst_57 = arith.constant dense<0.000000e+00> : vector<16xf32>
    %222 = vector.multi_reduction <add>, %216, %cst_57 [1] : vector<16x128xf32> to vector<16xf32>
    %223 = vector.shape_cast %222 : vector<16xf32> to vector<16x1xf32>
    %224 = arith.mulf %216, %221 : vector<16x128xf32>
    %cst_58 = arith.constant dense<0.000000e+00> : vector<16xf32>
    %225 = vector.multi_reduction <add>, %224, %cst_58 [1] : vector<16x128xf32> to vector<16xf32>
    %226 = vector.shape_cast %225 : vector<16xf32> to vector<16x1xf32>
    %227 = arith.mulf %224, %221 : vector<16x128xf32>
    %cst_59 = arith.constant dense<0.000000e+00> : vector<16xf32>
    %228 = vector.multi_reduction <add>, %227, %cst_59 [1] : vector<16x128xf32> to vector<16xf32>
    %229 = vector.shape_cast %228 : vector<16xf32> to vector<16x1xf32>
    %230 = arith.mulf %227, %221 : vector<16x128xf32>
    %cst_60 = arith.constant dense<0.000000e+00> : vector<16xf32>
    %231 = vector.multi_reduction <add>, %230, %cst_60 [1] : vector<16x128xf32> to vector<16xf32>
    %232 = vector.shape_cast %231 : vector<16xf32> to vector<16x1xf32>
    %233 = arith.mulf %230, %221 : vector<16x128xf32>
    %cst_61 = arith.constant dense<0.000000e+00> : vector<16xf32>
    %234 = vector.multi_reduction <add>, %233, %cst_61 [1] : vector<16x128xf32> to vector<16xf32>
    %235 = vector.shape_cast %234 : vector<16xf32> to vector<16x1xf32>
    %236 = vector.broadcast %6 : f32 to vector<16x128xf32>
    %237 = arith.subf %35, %236 : vector<16x128xf32>
    %238 = arith.mulf %237, %237 : vector<16x128xf32>
    %cst_62 = arith.constant -0.61728394 : f32
    %239 = vector.broadcast %cst_62 : f32 to vector<16x128xf32>
    %240 = arith.mulf %239, %238 : vector<16x128xf32>
    %241 = math.exp %240 : vector<16x128xf32>
    %242 = arith.mulf %241, %49 : vector<16x128xf32>
    %243 = vector.broadcast %3 : f32 to vector<16x128xf32>
    %244 = arith.mulf %243, %237 : vector<16x128xf32>
    %245 = math.exp %244 : vector<16x128xf32>
    %cst_63 = arith.constant 1.000000e+30 : f32
    %246 = vector.broadcast %cst_63 : f32 to vector<16x128xf32>
    %247 = arith.minimumf %245, %246 : vector<16x128xf32>
    %cst_64 = arith.constant dense<0.000000e+00> : vector<16xf32>
    %248 = vector.multi_reduction <add>, %242, %cst_64 [1] : vector<16x128xf32> to vector<16xf32>
    %249 = vector.shape_cast %248 : vector<16xf32> to vector<16x1xf32>
    %250 = arith.mulf %242, %247 : vector<16x128xf32>
    %cst_65 = arith.constant dense<0.000000e+00> : vector<16xf32>
    %251 = vector.multi_reduction <add>, %250, %cst_65 [1] : vector<16x128xf32> to vector<16xf32>
    %252 = vector.shape_cast %251 : vector<16xf32> to vector<16x1xf32>
    %253 = arith.mulf %250, %247 : vector<16x128xf32>
    %cst_66 = arith.constant dense<0.000000e+00> : vector<16xf32>
    %254 = vector.multi_reduction <add>, %253, %cst_66 [1] : vector<16x128xf32> to vector<16xf32>
    %255 = vector.shape_cast %254 : vector<16xf32> to vector<16x1xf32>
    %256 = arith.mulf %253, %247 : vector<16x128xf32>
    %cst_67 = arith.constant dense<0.000000e+00> : vector<16xf32>
    %257 = vector.multi_reduction <add>, %256, %cst_67 [1] : vector<16x128xf32> to vector<16xf32>
    %258 = vector.shape_cast %257 : vector<16xf32> to vector<16x1xf32>
    %259 = arith.mulf %256, %247 : vector<16x128xf32>
    %cst_68 = arith.constant dense<0.000000e+00> : vector<16xf32>
    %260 = vector.multi_reduction <add>, %259, %cst_68 [1] : vector<16x128xf32> to vector<16xf32>
    %261 = vector.shape_cast %260 : vector<16xf32> to vector<16x1xf32>
    %262 = vector.broadcast %7 : f32 to vector<16x128xf32>
    %263 = arith.subf %35, %262 : vector<16x128xf32>
    %264 = arith.mulf %263, %263 : vector<16x128xf32>
    %cst_69 = arith.constant -0.61728394 : f32
    %265 = vector.broadcast %cst_69 : f32 to vector<16x128xf32>
    %266 = arith.mulf %265, %264 : vector<16x128xf32>
    %267 = math.exp %266 : vector<16x128xf32>
    %268 = arith.mulf %267, %49 : vector<16x128xf32>
    %269 = vector.broadcast %3 : f32 to vector<16x128xf32>
    %270 = arith.mulf %269, %263 : vector<16x128xf32>
    %271 = math.exp %270 : vector<16x128xf32>
    %cst_70 = arith.constant 1.000000e+30 : f32
    %272 = vector.broadcast %cst_70 : f32 to vector<16x128xf32>
    %273 = arith.minimumf %271, %272 : vector<16x128xf32>
    %cst_71 = arith.constant dense<0.000000e+00> : vector<16xf32>
    %274 = vector.multi_reduction <add>, %268, %cst_71 [1] : vector<16x128xf32> to vector<16xf32>
    %275 = vector.shape_cast %274 : vector<16xf32> to vector<16x1xf32>
    %276 = arith.mulf %268, %273 : vector<16x128xf32>
    %cst_72 = arith.constant dense<0.000000e+00> : vector<16xf32>
    %277 = vector.multi_reduction <add>, %276, %cst_72 [1] : vector<16x128xf32> to vector<16xf32>
    %278 = vector.shape_cast %277 : vector<16xf32> to vector<16x1xf32>
    %279 = arith.mulf %276, %273 : vector<16x128xf32>
    %cst_73 = arith.constant dense<0.000000e+00> : vector<16xf32>
    %280 = vector.multi_reduction <add>, %279, %cst_73 [1] : vector<16x128xf32> to vector<16xf32>
    %281 = vector.shape_cast %280 : vector<16xf32> to vector<16x1xf32>
    %282 = arith.mulf %279, %273 : vector<16x128xf32>
    %cst_74 = arith.constant dense<0.000000e+00> : vector<16xf32>
    %283 = vector.multi_reduction <add>, %282, %cst_74 [1] : vector<16x128xf32> to vector<16xf32>
    %284 = vector.shape_cast %283 : vector<16xf32> to vector<16x1xf32>
    %285 = arith.mulf %282, %273 : vector<16x128xf32>
    %cst_75 = arith.constant dense<0.000000e+00> : vector<16xf32>
    %286 = vector.multi_reduction <add>, %285, %cst_75 [1] : vector<16x128xf32> to vector<16xf32>
    %287 = vector.shape_cast %286 : vector<16xf32> to vector<16x1xf32>
    %288 = vector.broadcast %8 : f32 to vector<16x128xf32>
    %289 = arith.subf %35, %288 : vector<16x128xf32>
    %290 = arith.mulf %289, %289 : vector<16x128xf32>
    %cst_76 = arith.constant -0.61728394 : f32
    %291 = vector.broadcast %cst_76 : f32 to vector<16x128xf32>
    %292 = arith.mulf %291, %290 : vector<16x128xf32>
    %293 = math.exp %292 : vector<16x128xf32>
    %294 = arith.mulf %293, %49 : vector<16x128xf32>
    %295 = vector.broadcast %3 : f32 to vector<16x128xf32>
    %296 = arith.mulf %295, %289 : vector<16x128xf32>
    %297 = math.exp %296 : vector<16x128xf32>
    %cst_77 = arith.constant 1.000000e+30 : f32
    %298 = vector.broadcast %cst_77 : f32 to vector<16x128xf32>
    %299 = arith.minimumf %297, %298 : vector<16x128xf32>
    %cst_78 = arith.constant dense<0.000000e+00> : vector<16xf32>
    %300 = vector.multi_reduction <add>, %294, %cst_78 [1] : vector<16x128xf32> to vector<16xf32>
    %301 = vector.shape_cast %300 : vector<16xf32> to vector<16x1xf32>
    %302 = arith.mulf %294, %299 : vector<16x128xf32>
    %cst_79 = arith.constant dense<0.000000e+00> : vector<16xf32>
    %303 = vector.multi_reduction <add>, %302, %cst_79 [1] : vector<16x128xf32> to vector<16xf32>
    %304 = vector.shape_cast %303 : vector<16xf32> to vector<16x1xf32>
    %305 = arith.mulf %302, %299 : vector<16x128xf32>
    %cst_80 = arith.constant dense<0.000000e+00> : vector<16xf32>
    %306 = vector.multi_reduction <add>, %305, %cst_80 [1] : vector<16x128xf32> to vector<16xf32>
    %307 = vector.shape_cast %306 : vector<16xf32> to vector<16x1xf32>
    %308 = arith.mulf %305, %299 : vector<16x128xf32>
    %cst_81 = arith.constant dense<0.000000e+00> : vector<16xf32>
    %309 = vector.multi_reduction <add>, %308, %cst_81 [1] : vector<16x128xf32> to vector<16xf32>
    %310 = vector.shape_cast %309 : vector<16xf32> to vector<16x1xf32>
    %311 = arith.mulf %308, %299 : vector<16x128xf32>
    %cst_82 = arith.constant dense<0.000000e+00> : vector<16xf32>
    %312 = vector.multi_reduction <add>, %311, %cst_82 [1] : vector<16x128xf32> to vector<16xf32>
    %313 = vector.shape_cast %312 : vector<16xf32> to vector<16x1xf32>
    %314 = tpu.concatenate %197, %200, %203, %206, %209, %223, %226, %229, %232, %235, %249, %252, %255, %258, %261, %275 in 1 : vector<16x1xf32>, vector<16x1xf32>, vector<16x1xf32>, vector<16x1xf32>, vector<16x1xf32>, vector<16x1xf32>, vector<16x1xf32>, vector<16x1xf32>, vector<16x1xf32>, vector<16x1xf32>, vector<16x1xf32>, vector<16x1xf32>, vector<16x1xf32>, vector<16x1xf32>, vector<16x1xf32>, vector<16x1xf32> -> vector<16x16xf32>
    %315 = tpu.concatenate %278, %281, %284, %287, %301, %304, %307, %310, %313 in 1 : vector<16x1xf32>, vector<16x1xf32>, vector<16x1xf32>, vector<16x1xf32>, vector<16x1xf32>, vector<16x1xf32>, vector<16x1xf32>, vector<16x1xf32>, vector<16x1xf32> -> vector<16x9xf32>
    %316 = tpu.concatenate %314, %315 in 1 : vector<16x16xf32>, vector<16x9xf32> -> vector<16x25xf32>
    %317 = arith.addf %32, %316 : vector<16x25xf32>
    %c0_83 = arith.constant 0 : index
    %c0_84 = arith.constant 0 : index
    %c0_85 = arith.constant 0 : index
    %318 = vector.load %arg5[%c0_83, %c0_84, %c0_85] : memref<1x32x25xf32, #tpu.memory_space<vmem>>, vector<1x32x25xf32>
    %319 = tpu.concatenate %183, %317 in 0 : vector<16x25xf32>, vector<16x25xf32> -> vector<32x25xf32>
    %320 = vector.shape_cast %319 : vector<32x25xf32> to vector<1x32x25xf32>
    %321 = arith.addf %318, %320 : vector<1x32x25xf32>
    %c0_86 = arith.constant 0 : index
    %c0_87 = arith.constant 0 : index
    %c0_88 = arith.constant 0 : index
    %322 = vector.load %arg5[%c0_86, %c0_87, %c0_88] : memref<1x32x25xf32, #tpu.memory_space<vmem>>, vector<1x32x25xf32>
    tpu.vector_store %arg5[%c0_86, %c0_87, %c0_88], %321 {strides = array<i32>} : memref<1x32x25xf32, #tpu.memory_space<vmem>>, vector<1x32x25xf32>,
    %c0_89 = arith.constant 0 : index
    %c0_90 = arith.constant 0 : index
    %c0_91 = arith.constant 0 : index
    %323 = vector.load %arg6[%c0_89, %c0_90, %c0_91] : memref<1x16x128xf32, #tpu.memory_space<vmem>>, vector<1x16x128xf32>
    %324 = vector.shape_cast %38 : vector<16x128xf32> to vector<1x16x128xf32>
    %325 = arith.addf %323, %324 : vector<1x16x128xf32>
    %c0_92 = arith.constant 0 : index
    %c0_93 = arith.constant 0 : index
    %c0_94 = arith.constant 0 : index
    %326 = vector.load %arg6[%c0_92, %c0_93, %c0_94] : memref<1x16x128xf32, #tpu.memory_space<vmem>>, vector<1x16x128xf32>
    tpu.vector_store %arg6[%c0_92, %c0_93, %c0_94], %325 {strides = array<i32>} : memref<1x16x128xf32, #tpu.memory_space<vmem>>, vector<1x16x128xf32>,
    return
  }
  func.func @transform_0(%arg0: i32, %arg1: i32) -> i32 {
    %c0_i32 = arith.constant 0 : i32
    %c0_i32_0 = arith.constant 0 : i32
    return %c0_i32 : i32
  }
  func.func @transform_1(%arg0: i32, %arg1: i32) -> (i32, i32) {
    %c1_i32 = arith.constant 1 : i32
    %0 = arith.muli %arg0, %c1_i32 : i32
    %1 = arith.addi %0, %arg1 : i32
    %c0_i32 = arith.constant 0 : i32
    %c0_i32_0 = arith.constant 0 : i32
    return %c0_i32, %1 : i32, i32
  }
  func.func @transform_2(%arg0: i32, %arg1: i32) -> (i32, i32) {
    %c1_i32 = arith.constant 1 : i32
    %0 = arith.muli %arg0, %c1_i32 : i32
    %1 = arith.addi %0, %arg1 : i32
    %c0_i32 = arith.constant 0 : i32
    %c0_i32_0 = arith.constant 0 : i32
    return %c0_i32, %1 : i32, i32
  }
  func.func @transform_3(%arg0: i32, %arg1: i32) -> (i32, i32, i32) {
    %c0_i32 = arith.constant 0 : i32
    %c0_i32_0 = arith.constant 0 : i32
    %c0_i32_1 = arith.constant 0 : i32
    return %arg0, %c0_i32, %c0_i32_0 : i32, i32, i32
  }
  func.func @transform_4(%arg0: i32, %arg1: i32) -> (i32, i32, i32) {
    %c0_i32 = arith.constant 0 : i32
    %c0_i32_0 = arith.constant 0 : i32
    %c0_i32_1 = arith.constant 0 : i32
    return %arg0, %c0_i32, %c0_i32_0 : i32, i32, i32
  }
}

</mosaic_0001>

<bundles_post_ra>
// kernel: tpu_custom_call.1
= control target key start
LH: loop header
LB: loop body
LE: loop exit
PB: predicated region body
PF: predicated region fallthrough
CT: control target
= control target key end

     0   :  { %s2095_s0 = inlined_call_operand.hbm [shape: f32[26], index: 0, kind: input, shape index: {}]   ;;  %s2096_s1 = inlined_call_operand.hbm [shape: f32[16,256], index: 1, kind: input, shape index: {}]   ;;  %s2097_s2 = inlined_call_operand.hbm [shape: f32[16,256], index: 2, kind: input, shape index: {}]   ;;  %s2098_s3 = inlined_call_operand.vmem [shape: f32[2,32,25], index: 3, kind: output, shape index: {0}]   ;;  %s2099_s4 = inlined_call_operand.hbm [shape: f32[2,16,128], index: 4, kind: output, shape index: {1}]  }
   0x1   :  { %2107 = sst [smem:[#allocation16_spill]] %s2095_s0 }
   0x2   :  { %2108 = sst [smem:[#allocation17_spill]] %s2096_s1 }
   0x3   :  { %10 = vsyncpa [#allocation5], 0 }
   0x4   :  { %11 = vsyncpa [#allocation3], 0 }
   0x5   :  { %13 = vsyncpa [#allocation3 + $0x1], 0 }
   0x6   :  { %14 = vsyncpa [#allocation8], 0 }
   0x7   :  { %16 = vsyncpa [#allocation8 + $0x1], 0 }
   0x8   :  { %17 = vsyncpa [#allocation4], 0 }
   0x9   :  { %19 = vsyncpa [#allocation4 + $0x1], 0  ;;  %s1570_s15 = smov 0   ;;  %s1572_s16 = smov 0  }
   0xa   :  { %s1574_s17 = smov 0   ;;  %s1576_s18 = smov 0  }
   0xb   :  { %s1578_s19 = smov 0   ;;  %s1580_s20 = smov 0  }
   0xc LB: > { %s1171_s21 = sadd.s32 4294967295, %s1532_s20   ;;  %s1172_s22 = sadd.s32 4294967294, %s1532_s20   ;;  %s1532_s20 = sphi %s1580_s20, %s25_s20   ;;  %s1528_s19 = sphi %s1578_s19, %s2133_s19   ;;  %s1524_s18 = sphi %s1576_s18, %s2132_s18   ;;  %s1520_s17 = sphi %s1574_s17, %s2131_s17   ;;  %s1516_s16 = sphi %s1572_s16, %s2130_s16   ;;  %s1512_s15 = sphi %s1570_s15, %s2129_s15  }
   0xd   : > { %s67_s23 = sadd.s32 1, %s1520_s17  ;;  %p74_p0 = scmp.ne.s32.totalorder %s1520_s17, %s1516_s16 }
   0xe   : > { %p75_p1 = scmp.eq.s32.totalorder %s1532_s20, 0  ;;  %p80_p2 = scmp.ne.s32.totalorder %s1516_s16, %s1512_s15 }
   0xf   : > { %p1608_p3 = scmp.eq.s32.totalorder %s1171_s21, 0  ;;  %p158_p4 = scmp.eq.s32.totalorder %s1171_s21, 1 }
  0x10   : > { %p76_p5 = por %p75_p1, %p74_p0  ;;  %p164_p6 = scmp.eq.s32.totalorder %s1172_s22, 1 }
  0x11   : > { %s2109_s24 = scalar_select %p1608_p3, 1, 0 }
  0x12   : > { %p1614_p7 = por %p1608_p3, %p80_p2  ;;  %p1618_p8 = por %p158_p4, %p74_p0 }
  0x13   : > { %p1622_p9 = por %p164_p6, %p80_p2  ;;  %p1173_p10 = scmp.ge.s32.totalorder %s1532_s20, 1 }
  0x14   : > { %s2110_s25 = scalar_select %p1614_p7, 1, 0 }
  0x15   : > { %s2111_s26 = scalar_select %p1618_p8, 1, 0 }
  0x16   : > { %s2112_s27 = scalar_select %p1622_p9, 1, 0 }
  0x17   : > { %p171_p11 = scmp.lt.s32.totalorder %s1532_s20, 3  ;;  %p1228_p1 = scmp.lt.s32.totalorder %s1532_s20, 2 }
  0x18   : > { %s1635_s29 = sand.u32 1, %s1520_s17   ;;  %s37_s5 = sadd.s32 1, %s1528_s19 }
  0x19   : > { %p1629_p13 = pnand %p1173_p10, %p171_p11  ;;  %p1639_p4 = pnand %p1228_p1, %p76_p5 }
  0x1a   : > { %s2100_s6 = sshll.u32 %s1635_s29, 4  ;;  %p39_p6 = scmp.ge.s32.totalorder %s37_s5, 2 }
  0x1b   : > { %p1212_p0 = pneg %p1629_p13  ;;  %s2115_s0 = sld [smem:[#allocation16_spill]] }
  0x1d   : > { %p1213_p2 = pnand %p1212_p0, %p1608_p3 }
  0x1f   : > { %p1371_p11 = pneg %p1213_p2 }
  0x21   : > { %s1369_s9 = scalar_lea.hbm %s2115_s0, 16 }
  0x22   : > { %p1370_p10 = scmp.ne.s32.totalorder %s2115_s0, %s1369_s9  ;;  %p1376_p5 = scmp.lt.u32.totalorder %s1369_s9, %s2115_s0 }
  0x24   : > { %p1372_p12 = pnand %p1371_p11, %p1370_p10 }
  0x26   : > { %p1373_p9 = pneg %p1372_p12 }
  0x28   : > { %p1378_p1 = pnand %p1376_p5, %p1373_p9 }
  0x2a   : > { %1381 = shalt.err (!%p1378_p1)
}
  0x2b   : > { %s1534_s14 = smov [#allocation2]   ;;  %s2135_s5 = smov (%p39_p6, %s37_s5), 0 }
  0x2c   : > { %1215 = dma.hbm_to_smem (!%p1213_p2), %s2115_s0, 16, %s1534_s14, [#allocation5]  }
  0x2d   : > { %2116 = sst [smem:[#allocation14_spill]] %s2135_s5  ;;  %s1177_s7 = sshll.u32 %s1528_s19, 7 }
  0x2e   : > { %s64_s8 = ssub.s32 %s1528_s19, %s2135_s5  ;;  %s2117_s1 = sld [smem:[#allocation17_spill]] }
  0x2f   : > { %p65_p9 = scmp.eq.s32.totalorder %s64_s8, 0  ;;  %s197_s12 = scalar_lea.vmem [#allocation6], %s2100_s6 }
  0x30   : > { %s204_s13 = sshll.u32 %s197_s12, 4  ;;  %s194_s21 = scalar_lea.sflag [#allocation3], %s1635_s29  ;;  %s1673_s13 = int_to_ptr.vmem [resolvable:$true] %s204_s13 }
  0x31   : > { %s1678_s14 = scalar_select %p65_p9, %s1520_s17, %s67_s23  }
  0x32   : > { %p1384_p0 = pneg %p1639_p4 }
  0x33   : > { %2118 = sst [smem:[#allocation15_spill]] %s1678_s14 }
  0x34   : > { %s1669_s11 = scalar_lea.hbm %s2117_s1, %s1177_s7  ;;  %s1387_s8 = scalar_lea.hbm %s2117_s1, 512 }
  0x35   : > { %s1382_s22 = scalar_lea.hbm %s1669_s11, 256  ;;  %p1388_p10 = scmp.lt.u32.totalorder %s1669_s11, %s2117_s1 }
  0x36   : > { %p1383_p12 = scmp.ne.s32.totalorder %s1669_s11, %s1382_s22  ;;  %p1389_p11 = scmp.lt.u32.totalorder %s1387_s8, %s1382_s22 }
  0x37   : > { %p1391_p1 = scmp.lt.u32.totalorder %s1382_s22, %s1669_s11 }
  0x38   : > { %p1385_p2 = pnand %p1384_p0, %p1383_p12  ;;  %p1390_p5 = por %p1389_p11, %p1388_p10 }
  0x3a   : > { %p1386_p6 = pneg %p1385_p2  ;;  %p1392_p9 = por %p1391_p1, %p1390_p5 }
  0x3c   : > { %p1393_p8 = pnand %p1392_p9, %p1386_p6 }
  0x3e   : > { %1396 = shalt.err (!%p1393_p8)
}
  0x3f   : > { %s1397_s23 = scalar_lea.vmem %s1673_s13, 256  ;;  %s1535_s9 = smov [#allocation6]  }
  0x40   : > { %p1398_p12 = scmp.ne.s32.totalorder %s1673_s13, %s1397_s23  ;;  %s1402_s10 = sshll.u32 %s1535_s9, 4  ;;  %s1403_s10 = int_to_ptr.vmem [resolvable:$false] %s1402_s10 }
  0x41   : > { %s1404_s6 = scalar_lea.vmem %s1403_s10, 512  ;;  %p1405_p3 = scmp.lt.s32.totalorder %s1673_s13, %s1403_s10 }
  0x42   : > { %p1400_p2 = pnand %p1398_p12, %p1384_p0  ;;  %p1406_p10 = scmp.lt.s32.totalorder %s1404_s6, %s1397_s23 }
  0x44   : > { %p1401_p7 = pneg %p1400_p2  ;;  %p1407_p11 = por %p1406_p10, %p1405_p3 }
  0x46   : > { %p1408_p5 = pnand %p1407_p11, %p1401_p7 }
  0x48   : > { %1411 = shalt.err (!%p1408_p5)
}
  0x49   : > { %s1536_s22 = smov 256   ;;  %s1537_s8 = smov 128  }
  0x4a   : > { %s1538_s12 = smov 8   ;;  %s1716_s10 = scalar_lea.hbm %s2097_s2, %s1177_s7 }
  0x4b   : > { %1219 = dma.hbm_to_vmem [thread:$0]  (!%p1639_p4), %s1669_s11, 256, %s1673_s13, %s194_s21, %s1536_s22, %s1537_s8, %s1538_s12  }
  0x4c   : > { %s2119_s6 = sshll.u32 %s1635_s29, 4  ;;  %s215_s5 = scalar_lea.sflag [#allocation8], %s1635_s29 }
  0x4d   : > { %s218_s0 = scalar_lea.vmem [#allocation7], %s2119_s6  ;;  %s1412_s14 = scalar_lea.hbm %s1716_s10, 256 }
  0x4e   : > { %s225_s1 = sshll.u32 %s218_s0, 4  ;;  %p1413_p3 = scmp.ne.s32.totalorder %s1716_s10, %s1412_s14  ;;  %s1720_s1 = int_to_ptr.vmem [resolvable:$true] %s225_s1 }
  0x4f   : > { %s1417_s7 = scalar_lea.hbm %s2097_s2, 512  ;;  %p1418_p6 = scmp.lt.u32.totalorder %s1716_s10, %s2097_s2 }
  0x50   : > { %p1415_p7 = pnand %p1413_p3, %p1384_p0  ;;  %p1419_p1 = scmp.lt.u32.totalorder %s1417_s7, %s1412_s14 }
  0x51   : > { %p1421_p12 = scmp.lt.u32.totalorder %s1412_s14, %s1716_s10 }
  0x52   : > { %p1416_p8 = pneg %p1415_p7  ;;  %p1420_p9 = por %p1419_p1, %p1418_p6 }
  0x54   : > { %p1422_p2 = por %p1421_p12, %p1420_p9 }
  0x56   : > { %p1423_p10 = pnand %p1422_p2, %p1416_p8 }
  0x58   : > { %1426 = shalt.err (!%p1423_p10)
}
  0x59   : > { %s1427_s0 = scalar_lea.vmem %s1720_s1, 256  ;;  %s1539_s9 = smov [#allocation7]  }
  0x5a   : > { %p1428_p11 = scmp.ne.s32.totalorder %s1720_s1, %s1427_s0  ;;  %s1432_s6 = sshll.u32 %s1539_s9, 4  ;;  %s1433_s6 = int_to_ptr.vmem [resolvable:$false] %s1432_s6 }
  0x5b   : > { %s1434_s11 = scalar_lea.vmem %s1433_s6, 512  ;;  %p1435_p7 = scmp.lt.s32.totalorder %s1720_s1, %s1433_s6 }
  0x5c   : > { %p1430_p5 = pnand %p1428_p11, %p1384_p0  ;;  %p1436_p6 = scmp.lt.s32.totalorder %s1434_s11, %s1427_s0 }
  0x5e   : > { %p1431_p3 = pneg %p1430_p5  ;;  %p1437_p1 = por %p1436_p6, %p1435_p7 }
  0x60   : > { %p1438_p9 = pnand %p1437_p1, %p1431_p3 }
  0x62   : > { %1441 = shalt.err (!%p1438_p9)
}
  0x63   : > { %1222 = dma.hbm_to_vmem [thread:$0]  (!%p1639_p4), %s1716_s10, 256, %s1720_s1, %s215_s5, %s1536_s22, %s1537_s8, %s1538_s12  }
  0x64   : > { %237 = sbr.rel (%p1629_p13) target bundleno = 630 (0x276), region = 32  ;;  %p2120_p0 = scmp.ne.s32.totalorder (!%p1629_p13), %s2109_s24, 0 }
  0x6b   : > { %1495 = dma.done.wait (%p2120_p0), [#allocation5], 16  }
  0x6c   : > { %1497 = vsyncadd (%p2120_p0), [#allocation5], 4294967280  ;;  %s1758_s30 = sand.u32 1, %s1516_s16   ;;  %p2121_p4 = scmp.ne.s32.totalorder %s2110_s25, 0 }
  0x6d   : > { %s1761_s14 = sshll.u32 %s1758_s30, 4  ;;  %s244_s29 = scalar_lea.sflag [#allocation3], %s1758_s30 }
  0x6e   : > { %s1765_s1 = scalar_lea.vmem [#allocation6], %s1761_s14 }
  0x6f   : > { %1499 = dma.done.wait (%p2121_p4), %s244_s29, 256  }
  0x70   : > { %1501 = vsyncadd (%p2121_p4), %s244_s29, 4294967040  ;;  %s253_s24 = scalar_lea.sflag [#allocation8], %s1758_s30  ;;  %s256_s28 = scalar_lea.vmem [#allocation7], %s1761_s14 }
  0x71   : > { %1503 = dma.done.wait (%p2121_p4), %s253_s24, 256  }
  0x72   : > { %1505 = vsyncadd (%p2121_p4), %s253_s24, 4294967040 }
  0x73   : > { %261 = sfence }
  0x74   : > { %s1188_s5 = sld [smem:[#allocation2 + $0x5]]  ;;  %v318_v0 = vlaneseq  ;;  %s311_s22 = sld [smem:[#allocation2]]  ;;  %v1779_v3 = vld [vmem:[%s1765_s1 + $0x8] sm:$0xff]  ;;  %v1782_v4 = vld [vmem:[%s1765_s1] sm:$0xff]  ;;  %v1540_v41 = vmov 0.0   ;;  %vm615_vm2 = vcmask 7168  }
  0x75   : > { %s1187_s8 = sld [smem:[#allocation2 + $0x19]]  ;;  %s1192_s12 = sshll.u32 %s1524_s18, 7  ;;  %vm618_vm3 = vcmask 15360   ;;  %vm621_vm4 = vcmask 23552   ;;  %vm624_vm5 = vcmask 31744   ;;  %vm627_vm6 = vcmask 39936  }
  0x76   : > { %v319_v1 = vshrl.u32 %v318_v0, 7  ;;  %v359_v5 = vstv %s1192_s12  ;;  %v358_v7 = vand.u32 127, %v318_v0  ;;  %s1189_s25 = sld [smem:[#allocation2 + $0xa]]  ;;  %s1190_s10 = sld [smem:[#allocation2 + $0xf]]  ;;  %vm630_vm7 = vcmask 48128  }
  0x77   : > { %s1191_s13 = sld [smem:[#allocation2 + $0x14]]  ;;  %vm633_vm8 = vcmask 56320   ;;  %vm636_vm9 = vcmask 64512   ;;  %vm639_vm10 = vcmask 72704   ;;  %vm642_vm11 = vcmask 80896   ;;  %p294_p13 = scmp.lt.s32.totalorder %s1524_s18, 1 }
  0x78   : > { %v320_v2 = vadd.s32 8, %v319_v1  ;;  %v325_v16 = vand.u32 7, %v319_v1  ;;  %v360_v20 = vadd.s32 %v359_v5, %v358_v7  ;;  %vm645_vm12 = vcmask 89088   ;;  %s1541_s6 = smov 16   ;;  %s1201_s11 = sshll.u32 %s1524_s18, 8 }
  0x79   : > { %vm648_vm13 = vcmask 97280   ;;  %vm651_vm14 = vcmask 105472   ;;  %vm654_vm15 = vcmask 113664   ;;  %s295_s7 = scalar_select %p294_p13, %s1524_s18, 1 }
  0x7a   : > { %v1784_v6 = vstv %s1188_s5  ;;  %v1788_v9 = vstv %s311_s22  ;;  %v332_v11 = vand.u32 7, %v320_v2  ;;  %v345_v29 = vmul.u32 256, %v325_v16  ;;  %s291_s29 = scalar_lea.vmem [#allocation9], %s1761_s14  ;;  %s2002_s5 = scalar_lea.hbm %s2099_s4, %s1201_s11 }
  0x7b   : > { %v421_v8 = vsub.f32 %v1779_v3, %v1784_v6  ;;  %v420_v10 = vsub.f32 %v1782_v4, %v1784_v6  ;;  %v370_v12 = vsub.f32 %v1782_v4, %v1788_v9  ;;  %v371_v13 = vsub.f32 %v1779_v3, %v1788_v9  ;;  %s1200_s21 = sshll.u32 %s295_s7, 5  ;;  %s1012_s18 = scalar_lea.sflag [#allocation4], %s1758_s30 }
  0x7c   : > { %v1796_v14 = vstv %s1187_s8  ;;  %v346_v24 = vmul.u32 256, %v332_v11  ;;  %v361_v38 = vadd.s32 %v360_v20, %v345_v29  ;;  %v1811_v53 = vstv %s1189_s25  ;;  %s1911_s9 = scalar_lea.vmem %s2098_s3, %s1200_s21  ;;  %p2122_p12 = scmp.ne.s32.totalorder %s2111_s26, 0 }
  0x7d   : > { %v423_v15 = vmul.f32 %v421_v8, %v421_v8  ;;  %v422_v17 = vmul.f32 %v420_v10, %v420_v10  ;;  %v372_v18 = vmul.f32 %v370_v12, %v370_v12  ;;  %v373_v19 = vmul.f32 %v371_v13, %v371_v13  ;;  %s1542_s22 = smov [#allocation9]  }
  0x7e   : > { %v383_v22 = vmul.f32 %v1796_v14, %v370_v12  ;;  %v384_v27 = vmul.f32 %v1796_v14, %v371_v13  ;;  %v432_v30 = vmul.f32 %v420_v10, %v1796_v14  ;;  %v433_v34 = vmul.f32 %v421_v8, %v1796_v14  ;;  %s1446_s8 = sshll.u32 %s1542_s22, 4  ;;  %s1447_s8 = int_to_ptr.vmem [resolvable:$false] %s1446_s8 }
  0x7f   : > { %v425_v21 = vmul.f32 -0.61728394, %v423_v15  ;;  %v424_v23 = vmul.f32 -0.61728394, %v422_v17  ;;  %v374_v25 = vmul.f32 -0.61728394, %v372_v18  ;;  %v362_v36 = vadd.s32 %v360_v20, %v346_v24 }
  0x80   : > { %v375_v26 = vmul.f32 -0.61728394, %v373_v19  ;;  %v385_v33 = vmul.f32 1.442695, %v383_v22  ;;  %v387_v37 = vmul.f32 1.442695, %v384_v27  ;;  %v470_v59 = vsub.f32 %v1779_v3, %v1811_v53 }
  0x81   : > { %v428_v28 = vmul.f32 1.442695, %v425_v21  ;;  %v376_v31 = vmul.f32 1.442695, %v374_v25  ;;  %v426_v35 = vmul.f32 1.442695, %v424_v23  ;;  %v469_v0 = vsub.f32 %v1782_v4, %v1811_v53 }
  0x82   : > { %v378_v32 = vmul.f32 1.442695, %v375_v26  ;;  %v434_v39 = vmul.f32 1.442695, %v432_v30  ;;  %v436_v40 = vmul.f32 1.442695, %v433_v34  ;;  %v472_v5 = vmul.f32 %v470_v59, %v470_v59 }
  0x83   : > { %1287 = vpow2.f32 %v428_v28  ;;  %vm364_vm0 = vcmp.lt.s32.totalorder %v362_v36, 1024  ;;  %vm363_vm1 = vcmp.lt.s32.totalorder %v361_v38, 1024  ;;  %v471_v7 = vmul.f32 %v469_v0, %v469_v0  ;;  %s1448_s12 = scalar_lea.vmem %s1447_s8, 512 }
  0x84   : > { %1289 = vpow2.f32 %v376_v31  ;;  %v1803_v42 = vsel %vm364_vm0, 1.0, %v1540_v41  ;;  %v1806_v43 = vsel %vm363_vm1, 1.0, %v1540_v41  ;;  %v474_v11 = vmul.f32 -0.61728394, %v472_v5 }
  0x85   : > { %1291 = vpow2.f32 %v378_v32  ;;  %v473_v12 = vmul.f32 -0.61728394, %v471_v7  ;;  %v482_v13 = vmul.f32 %v470_v59, %v1796_v14  ;;  %v481_v15 = vmul.f32 %v469_v0, %v1796_v14 }
  0x86   : > { %1293 = vpow2.f32 %v385_v33  ;;  %v477_v18 = vmul.f32 1.442695, %v474_v11  ;;  %v1820_v24 = vstv %s1190_s10  ;;  %vm2106_vm0 = vcmask 121856  }
  0x87   : > { %1295 = vpow2.f32 %v426_v35  ;;  %v475_v19 = vmul.f32 1.442695, %v473_v12  ;;  %v485_v20 = vmul.f32 1.442695, %v482_v13  ;;  %v483_v21 = vmul.f32 1.442695, %v481_v15 }
  0x88   : > { %1297 = vpow2.f32 %v387_v37  ;;  %v519_v25 = vsub.f32 %v1779_v3, %v1820_v24  ;;  %v518_v28 = vsub.f32 %v1782_v4, %v1820_v24  ;;  %vm303_vm1 = vcmask 203776  }
  0x89   : > { %1299 = vpow2.f32 %v434_v39  ;;  %305 = vst.msk [vmem:[%s1911_s9 + $0x8] sm:$0xff] %vm303_vm1, %v1540_v41  ;;  %304 = vst.msk [vmem:[%s1911_s9] sm:$0xff] %vm303_vm1, %v1540_v41 }
  0x8a   : > { %1301 = vpow2.f32 %v436_v40  ;;  %v521_v29 = vmul.f32 %v519_v25, %v519_v25  ;;  %v520_v32 = vmul.f32 %v518_v28, %v518_v28  ;;  %306 = vst.msk [vmem:[%s1911_s9 + $0x10] sm:$0xff] %vm303_vm1, %v1540_v41  ;;  %307 = vst.msk [vmem:[%s1911_s9 + $0x18] sm:$0xff] %vm303_vm1, %v1540_v41 }
  0x8b   : > { %1303 = vpow2.f32 %v477_v18 }
  0x8c   : > { %1305 = vpow2.f32 %v475_v19  ;;  %v523_v35 = vmul.f32 -0.61728394, %v521_v29  ;;  %v522_v40 = vmul.f32 -0.61728394, %v520_v32 }
  0x8d   : > { %v1288_v44 = vpop.eup %1287  ;;  %1307 = vpow2.f32 %v485_v20 }
  0x8e   : > { %v1290_v45 = vpop.eup %1289  ;;  %v431_v46 = vmul.f32 %v1288_v44, %v1803_v42  ;;  %1309 = vpow2.f32 %v483_v21  ;;  %v531_v44 = vmul.f32 %v519_v25, %v1796_v14  ;;  %v1842_v21 = vld [vmem:[%s256_s28 + $0x8] sm:$0xff]  ;;  %v1846_v25 = vld [vmem:[%s256_s28] sm:$0xff] }
  0x8f   : > { %v1292_v47 = vpop.eup %1291  ;;  %v380_v48 = vmul.f32 %v1290_v45, %v1806_v43  ;;  %v526_v45 = vmul.f32 1.442695, %v523_v35  ;;  %v833_v29 = vsub.f32 %v1846_v25, %v1820_v24 }
  0x90   : > { %v1294_v49 = vpop.eup %1293  ;;  %442 = vadd.xlane.f32.xlu1 %v431_v46  ;;  %v381_v51 = vmul.f32 %v1292_v47, %v1803_v42 }
  0x91   : > { %v1296_v50 = vpop.eup %1295  ;;  %391 = vadd.xlane.f32.xlu0 %v380_v48  ;;  %v389_v52 = vmin.f32 %v1294_v49, 1e+30  ;;  %1311 = vpow2.f32 %v526_v45 }
  0x92   : > { %v1298_v54 = vpop.eup %1297  ;;  %v430_v60 = vmul.f32 %v1296_v50, %v1806_v43 }
  0x93   : > { %v1300_v55 = vpop.eup %1299  ;;  %v395_v56 = vmul.f32 %v389_v52, %v380_v48  ;;  %v390_v57 = vmin.f32 %v1298_v54, 1e+30 }
  0x94   : > { %v1302_v58 = vpop.eup %1301  ;;  %v438_v62 = vmin.f32 %v1300_v55, 1e+30 }
  0x95   : > { %393 = vadd.xlane.f32.xlu0 %v381_v51  ;;  %397 = vadd.xlane.f32.xlu1 %v395_v56  ;;  %v396_v61 = vmul.f32 %v390_v57, %v381_v51  ;;  %v439_v63 = vmin.f32 %v1302_v58, 1e+30  ;;  %v401_v10 = vmul.f32 %v395_v56, %v389_v52  ;;  %v1304_v33 = vpop.eup %1303  ;;  %v524_v51 = vmul.f32 1.442695, %v522_v40 }
  0x96   : > { %v444_v1 = vmul.f32 %v438_v62, %v430_v60  ;;  %v1306_v34 = vpop.eup %1305  ;;  %v480_v47 = vmul.f32 %v1304_v33, %v1803_v42  ;;  %v835_v33 = vmul.f32 %v833_v29, %v833_v29 }
  0x97   : > { %v445_v2 = vmul.f32 %v439_v63, %v431_v46  ;;  %v402_v8 = vmul.f32 %v396_v61, %v390_v57  ;;  %v407_v23 = vmul.f32 %v401_v10, %v389_v52  ;;  %v1308_v36 = vpop.eup %1307  ;;  %v530_v46 = vmul.f32 %v518_v28, %v1796_v14 }
  0x98   : > { %v450_v17 = vmul.f32 %v444_v1, %v438_v62  ;;  %v1310_v39 = vpop.eup %1309  ;;  %v479_v48 = vmul.f32 %v1306_v34, %v1806_v43  ;;  %v488_v49 = vmin.f32 %v1308_v36, 1e+30  ;;  %1313 = vpow2.f32 %v524_v51 }
  0x99   : > { %440 = vadd.xlane.f32.xlu0 %v430_v60  ;;  %399 = vadd.xlane.f32.xlu1 %v396_v61  ;;  %v451_v16 = vmul.f32 %v445_v2, %v439_v63  ;;  %v408_v22 = vmul.f32 %v402_v8, %v390_v57  ;;  %v413_v31 = vmul.f32 %v407_v23, %v389_v52  ;;  %v487_v50 = vmin.f32 %v1310_v39, 1e+30 }
  0x9a   : > { %v456_v27 = vmul.f32 %v450_v17, %v438_v62  ;;  %v534_v52 = vmul.f32 1.442695, %v531_v44  ;;  %v532_v54 = vmul.f32 1.442695, %v530_v46  ;;  %v494_v55 = vmul.f32 %v488_v49, %v480_v47 }
  0x9b   : > { %v457_v26 = vmul.f32 %v451_v16, %v439_v63  ;;  %v414_v30 = vmul.f32 %v408_v22, %v390_v57  ;;  %v493_v56 = vmul.f32 %v487_v50, %v479_v48  ;;  %v1830_v57 = vstv %s1191_s13 }
  0x9c   : > { %v462_v38 = vmul.f32 %v456_v27, %v438_v62  ;;  %1315 = vpow2.f32 %v534_v52  ;;  %v568_v58 = vsub.f32 %v1779_v3, %v1830_v57  ;;  %v500_v59 = vmul.f32 %v494_v55, %v488_v49 }
  0x9d   : > { %446 = vadd.xlane.f32.xlu0 %v444_v1  ;;  %448 = vadd.xlane.f32.xlu1 %v445_v2  ;;  %v463_v37 = vmul.f32 %v457_v26, %v439_v63  ;;  %1317 = vpow2.f32 %v532_v54  ;;  %v499_v60 = vmul.f32 %v493_v56, %v487_v50  ;;  %v567_v61 = vsub.f32 %v1782_v4, %v1830_v57  ;;  %v1312_v2 = vpop.eup %1311 }
  0x9e   : > { %v570_v62 = vmul.f32 %v568_v58, %v568_v58  ;;  %v506_v63 = vmul.f32 %v500_v59, %v488_v49  ;;  %v580_v4 = vmul.f32 %v568_v58, %v1796_v14  ;;  %v834_v28 = vsub.f32 %v1842_v21, %v1820_v24 }
  0x9f   : > { %v505_v0 = vmul.f32 %v499_v60, %v487_v50  ;;  %v569_v1 = vmul.f32 %v567_v61, %v567_v61  ;;  %v579_v15 = vmul.f32 %v567_v61, %v1796_v14  ;;  %v837_v39 = vmul.f32 -0.61728394, %v835_v33 }
  0xa0   : > { %v572_v7 = vmul.f32 -0.61728394, %v570_v62  ;;  %v512_v3 = vmul.f32 %v506_v63, %v488_v49  ;;  %v836_v32 = vmul.f32 %v834_v28, %v834_v28  ;;  %v845_v44 = vmul.f32 %v833_v29, %v1796_v14 }
  0xa1   : > { %405 = vadd.xlane.f32.xlu1 %v402_v8  ;;  %403 = vadd.xlane.f32.xlu0 %v401_v10  ;;  %v511_v10 = vmul.f32 %v505_v0, %v487_v50  ;;  %v571_v12 = vmul.f32 -0.61728394, %v569_v1  ;;  %v839_v50 = vmul.f32 1.442695, %v837_v39  ;;  %v881_v61 = vsub.f32 %v1846_v25, %v1830_v57 }
  0xa2   : > { %v1314_v5 = vpop.eup %1313  ;;  %v575_v13 = vmul.f32 1.442695, %v572_v7  ;;  %v838_v36 = vmul.f32 -0.61728394, %v836_v32  ;;  %v847_v52 = vmul.f32 1.442695, %v845_v44 }
  0xa3   : > { %v573_v20 = vmul.f32 1.442695, %v571_v12  ;;  %v883_v1 = vmul.f32 %v881_v61, %v881_v61 }
  0xa4   : > { %1319 = vpow2.f32 %v575_v13 }
  0xa5   : > { %454 = vadd.xlane.f32.xlu1 %v451_v16  ;;  %452 = vadd.xlane.f32.xlu0 %v450_v17  ;;  %v529_v16 = vmul.f32 %v1312_v2, %v1803_v42  ;;  %v528_v17 = vmul.f32 %v1314_v5, %v1806_v43  ;;  %1321 = vpow2.f32 %v573_v20  ;;  %v885_v12 = vmul.f32 -0.61728394, %v883_v1 }
  0xa6   : > { %v1316_v8 = vpop.eup %1315 }
  0xa7   : > { %v1318_v11 = vpop.eup %1317  ;;  %v537_v18 = vmin.f32 %v1316_v8, 1e+30 }
  0xa8   : > { %v536_v19 = vmin.f32 %v1318_v11, 1e+30 }
  0xa9   : > { %411 = vadd.xlane.f32.xlu1 %v408_v22  ;;  %409 = vadd.xlane.f32.xlu0 %v407_v23  ;;  %v583_v22 = vmul.f32 1.442695, %v580_v4  ;;  %v581_v23 = vmul.f32 1.442695, %v579_v15 }
  0xab   : > { %1323 = vpow2.f32 %v583_v22  ;;  %v887_v22 = vmul.f32 1.442695, %v885_v12 }
  0xac   : > { %1325 = vpow2.f32 %v581_v23 }
  0xad   : > { %460 = vadd.xlane.f32.xlu1 %v457_v26  ;;  %458 = vadd.xlane.f32.xlu0 %v456_v27  ;;  %v543_v26 = vmul.f32 %v537_v18, %v529_v16  ;;  %v542_v27 = vmul.f32 %v536_v19, %v528_v17 }
  0xb1   : > { %417 = vadd.xlane.f32.xlu1 %v414_v30  ;;  %415 = vadd.xlane.f32.xlu0 %v413_v31  ;;  %v549_v30 = vmul.f32 %v543_v26, %v537_v18  ;;  %v548_v31 = vmul.f32 %v542_v27, %v536_v19 }
  0xb3   : > { %v555_v34 = vmul.f32 %v549_v30, %v537_v18  ;;  %v554_v35 = vmul.f32 %v548_v31, %v536_v19 }
  0xb5   : > { %466 = vadd.xlane.f32.xlu1 %v463_v37  ;;  %464 = vadd.xlane.f32.xlu0 %v462_v38  ;;  %v846_v37 = vmul.f32 %v834_v28, %v1796_v14  ;;  %v1320_v38 = vpop.eup %1319  ;;  %v561_v45 = vmul.f32 %v555_v34, %v537_v18  ;;  %v560_v46 = vmul.f32 %v554_v35, %v536_v19 }
  0xb6   : > { %v1322_v40 = vpop.eup %1321  ;;  %v578_v51 = vmul.f32 %v1320_v38, %v1803_v42 }
  0xb7   : > { %v1324_v24 = vpop.eup %1323  ;;  %v849_v49 = vmul.f32 1.442695, %v846_v37  ;;  %v577_v54 = vmul.f32 %v1322_v40, %v1806_v43 }
  0xb9   : > { %491 = vadd.xlane.f32.xlu1 %v480_v47  ;;  %489 = vadd.xlane.f32.xlu0 %v479_v48  ;;  %v841_v47 = vmul.f32 1.442695, %v838_v36  ;;  %v1326_v48 = vpop.eup %1325 }
  0xbb   : > { %1327 = vpow2.f32 %v841_v47 }
  0xbc   : > { %1329 = vpow2.f32 %v849_v49 }
  0xbd   : > { %497 = vadd.xlane.f32.xlu1 %v494_v55  ;;  %495 = vadd.xlane.f32.xlu0 %v493_v56  ;;  %v586_v55 = vmin.f32 %v1324_v24, 1e+30  ;;  %v585_v56 = vmin.f32 %v1326_v48, 1e+30  ;;  %1331 = vpow2.f32 %v839_v50 }
  0xbe   : > { %1333 = vpow2.f32 %v847_v52 }
  0xbf   : > { %v592_v58 = vmul.f32 %v586_v55, %v578_v51 }
  0xc1   : > { %503 = vadd.xlane.f32.xlu1 %v500_v59  ;;  %501 = vadd.xlane.f32.xlu0 %v499_v60  ;;  %v591_v59 = vmul.f32 %v585_v56, %v577_v54  ;;  %v882_v60 = vsub.f32 %v1842_v21, %v1830_v57  ;;  %v598_v62 = vmul.f32 %v592_v58, %v586_v55 }
  0xc3   : > { %v604_v8 = vmul.f32 %v598_v62, %v586_v55  ;;  %v894_v4 = vmul.f32 %v882_v60, %v1796_v14 }
  0xc5   : > { %509 = vadd.xlane.f32.xlu1 %v506_v63  ;;  %507 = vadd.xlane.f32.xlu0 %v505_v0  ;;  %v597_v63 = vmul.f32 %v591_v59, %v585_v56  ;;  %v884_v0 = vmul.f32 %v882_v60, %v882_v60  ;;  %v1328_v2 = vpop.eup %1327  ;;  %v610_v13 = vmul.f32 %v604_v8, %v586_v55  ;;  %v897_v23 = vmul.f32 1.442695, %v894_v4 }
  0xc6   : > { %v1330_v5 = vpop.eup %1329  ;;  %v1862_v15 = vmul.f32 %v1328_v2, %v1803_v42 }
  0xc7   : > { %v1332_v7 = vpop.eup %1331 }
  0xc8   : > { %v1334_v11 = vpop.eup %1333  ;;  %v1866_v18 = vmul.f32 %v1332_v7, %v1806_v43 }
  0xc9   : > { %515 = vadd.xlane.f32.xlu1 %v512_v3  ;;  %513 = vadd.xlane.f32.xlu0 %v511_v10  ;;  %v603_v3 = vmul.f32 %v597_v63, %v585_v56  ;;  %v886_v10 = vmul.f32 -0.61728394, %v884_v0  ;;  %v851_v19 = vmin.f32 %v1334_v11, 1e+30 }
  0xcb   : > { %v609_v57 = vmul.f32 %v603_v3, %v585_v56  ;;  %v889_v20 = vmul.f32 1.442695, %v886_v10  ;;  %v857_v28 = vmul.f32 %v851_v19, %v1866_v18 }
  0xcd   : > { %540 = vadd.xlane.f32.xlu1 %v529_v16  ;;  %538 = vadd.xlane.f32.xlu0 %v528_v17  ;;  %v893_v16 = vmul.f32 %v881_v61, %v1796_v14  ;;  %v852_v17 = vmin.f32 %v1330_v5, 1e+30  ;;  %1335 = vpow2.f32 %v889_v20 }
  0xce   : > { %1337 = vpow2.f32 %v887_v22 }
  0xcf   : > { %1339 = vpow2.f32 %v897_v23 }
  0xd1   : > { %546 = vadd.xlane.f32.xlu1 %v543_v26  ;;  %544 = vadd.xlane.f32.xlu0 %v542_v27  ;;  %v895_v26 = vmul.f32 1.442695, %v893_v16  ;;  %v858_v27 = vmul.f32 %v852_v17, %v1862_v15 }
  0xd3   : > { %1341 = vpow2.f32 %v895_v26  ;;  %v864_v29 = vmul.f32 %v858_v27, %v852_v17 }
  0xd5   : > { %552 = vadd.xlane.f32.xlu1 %v549_v30  ;;  %550 = vadd.xlane.f32.xlu0 %v548_v31  ;;  %v863_v30 = vmul.f32 %v857_v28, %v851_v19  ;;  %v870_v31 = vmul.f32 %v864_v29, %v852_v17 }
  0xd7   : > { %v869_v32 = vmul.f32 %v863_v30, %v851_v19  ;;  %v1336_v33 = vpop.eup %1335  ;;  %v876_v36 = vmul.f32 %v870_v31, %v852_v17 }
  0xd8   : > { %v892_v39 = vmul.f32 %v1336_v33, %v1803_v42 }
  0xd9   : > { %558 = vadd.xlane.f32.xlu1 %v555_v34  ;;  %556 = vadd.xlane.f32.xlu0 %v554_v35  ;;  %v1338_v34 = vpop.eup %1337  ;;  %v875_v37 = vmul.f32 %v869_v32, %v851_v19 }
  0xda   : > { %v1340_v35 = vpop.eup %1339  ;;  %v891_v40 = vmul.f32 %v1338_v34, %v1806_v43 }
  0xdb   : > { %v900_v44 = vmin.f32 %v1340_v35, 1e+30 }
  0xdd   : > { %564 = vadd.xlane.f32.xlu1 %v561_v45  ;;  %562 = vadd.xlane.f32.xlu0 %v560_v46  ;;  %v1342_v38 = vpop.eup %1341  ;;  %v906_v45 = vmul.f32 %v900_v44, %v892_v39 }
  0xde   : > { %v899_v24 = vmin.f32 %v1342_v38, 1e+30 }
  0xdf   : > { %v912_v47 = vmul.f32 %v906_v45, %v900_v44 }
  0xe0   : > { %v905_v46 = vmul.f32 %v899_v24, %v891_v40 }
  0xe1   : > { %589 = vadd.xlane.f32.xlu1 %v578_v51  ;;  %587 = vadd.xlane.f32.xlu0 %v577_v54  ;;  %v918_v49 = vmul.f32 %v912_v47, %v900_v44 }
  0xe2   : > { %v911_v48 = vmul.f32 %v905_v46, %v899_v24 }
  0xe3   : > { %v924_v51 = vmul.f32 %v918_v49, %v900_v44 }
  0xe4   : > { %v917_v50 = vmul.f32 %v911_v48, %v899_v24 }
  0xe5   : > { %595 = vadd.xlane.f32.xlu1 %v592_v58  ;;  %593 = vadd.xlane.f32.xlu0 %v591_v59 }
  0xe6   : > { %v923_v52 = vmul.f32 %v917_v50, %v899_v24 }
  0xe9   : > { %601 = vadd.xlane.f32.xlu1 %v598_v62  ;;  %599 = vadd.xlane.f32.xlu0 %v597_v63 }
  0xed   : > { %607 = vadd.xlane.f32.xlu1 %v604_v8  ;;  %605 = vadd.xlane.f32.xlu0 %v603_v3 }
  0xf1   : > { %613 = vadd.xlane.f32.xlu1 %v610_v13  ;;  %611 = vadd.xlane.f32.xlu0 %v609_v57 }
  0xf5   : > { %861 = vadd.xlane.f32.xlu1 %v858_v27  ;;  %859 = vadd.xlane.f32.xlu0 %v857_v28 }
  0xf9   : > { %867 = vadd.xlane.f32.xlu1 %v864_v29  ;;  %865 = vadd.xlane.f32.xlu0 %v863_v30 }
  0xfd   : > { %873 = vadd.xlane.f32.xlu1 %v870_v31  ;;  %871 = vadd.xlane.f32.xlu0 %v869_v32 }
 0x101   : > { %879 = vadd.xlane.f32.xlu1 %v876_v36  ;;  %877 = vadd.xlane.f32.xlu0 %v875_v37 }
 0x105   : > { %903 = vadd.xlane.f32.xlu1 %v892_v39  ;;  %901 = vadd.xlane.f32.xlu0 %v891_v40 }
 0x109   : > { %909 = vadd.xlane.f32.xlu1 %v906_v45  ;;  %907 = vadd.xlane.f32.xlu0 %v905_v46 }
 0x10d   : > { %915 = vadd.xlane.f32.xlu1 %v912_v47  ;;  %913 = vadd.xlane.f32.xlu0 %v911_v48 }
 0x111   : > { %921 = vadd.xlane.f32.xlu1 %v918_v49  ;;  %919 = vadd.xlane.f32.xlu0 %v917_v50 }
 0x115   : > { %927 = vadd.xlane.f32.xlu1 %v924_v51  ;;  %925 = vadd.xlane.f32.xlu0 %v923_v52 }
 0x11d   : > { %v443_v54 = vpop.xlane.xlu1 %442 }
 0x11e   : > { %v392_v55 = vpop.xlane.xlu0 %391 }
 0x122   : > { %v394_v56 = vpop.xlane.xlu0 %393  ;;  %v398_v58 = vpop.xlane.xlu1 %397 }
 0x123   : > { %v616_v5 = vsel %vm615_vm2, %v392_v55, %v398_v58 }
 0x126   : > { %v441_v59 = vpop.xlane.xlu0 %440  ;;  %v400_v60 = vpop.xlane.xlu1 %399 }
 0x127   : > { %v617_v7 = vsel %vm615_vm2, %v394_v56, %v400_v60 }
 0x12a   : > { %v447_v61 = vpop.xlane.xlu0 %446  ;;  %v449_v62 = vpop.xlane.xlu1 %448 }
 0x12e   : > { %v406_v63 = vpop.xlane.xlu1 %405  ;;  %v404_v0 = vpop.xlane.xlu0 %403 }
 0x12f   : > { %v620_v8 = vsel %vm618_vm3, %v617_v7, %v406_v63  ;;  %v619_v3 = vsel %vm618_vm3, %v616_v5, %v404_v0 }
 0x132   : > { %v455_v1 = vpop.xlane.xlu1 %454  ;;  %v453_v2 = vpop.xlane.xlu0 %452 }
 0x136   : > { %v412_v10 = vpop.xlane.xlu1 %411  ;;  %v410_v11 = vpop.xlane.xlu0 %409 }
 0x137   : > { %v623_v12 = vsel %vm621_vm4, %v620_v8, %v412_v10  ;;  %v622_v4 = vsel %vm621_vm4, %v619_v3, %v410_v11 }
 0x13a   : > { %v461_v13 = vpop.xlane.xlu1 %460  ;;  %v459_v57 = vpop.xlane.xlu0 %458 }
 0x13e   : > { %v418_v16 = vpop.xlane.xlu1 %417  ;;  %v416_v17 = vpop.xlane.xlu0 %415 }
 0x13f   : > { %v626_v19 = vsel %vm624_vm5, %v623_v12, %v418_v16  ;;  %v625_v20 = vsel %vm624_vm5, %v622_v4, %v416_v17 }
 0x140   : > { %v629_v22 = vsel %vm627_vm6, %v626_v19, %v443_v54  ;;  %v628_v23 = vsel %vm627_vm6, %v625_v20, %v441_v59 }
 0x141   : > { %v632_v26 = vsel %vm630_vm7, %v629_v22, %v449_v62  ;;  %v631_v27 = vsel %vm630_vm7, %v628_v23, %v447_v61 }
 0x142   : > { %v635_v28 = vsel %vm633_vm8, %v632_v26, %v455_v1  ;;  %v467_v29 = vpop.xlane.xlu1 %466  ;;  %v634_v30 = vsel %vm633_vm8, %v631_v27, %v453_v2  ;;  %v465_v31 = vpop.xlane.xlu0 %464 }
 0x143   : > { %v638_v32 = vsel %vm636_vm9, %v635_v28, %v461_v13  ;;  %v637_v33 = vsel %vm636_vm9, %v634_v30, %v459_v57 }
 0x144   : > { %v641_v34 = vsel %vm639_vm10, %v638_v32, %v467_v29  ;;  %v640_v35 = vsel %vm639_vm10, %v637_v33, %v465_v31  ;;  %v690_v32 = vsub.f32 %v1842_v21, %v1788_v9 }
 0x146   : > { %v492_v36 = vpop.xlane.xlu1 %491  ;;  %v490_v37 = vpop.xlane.xlu0 %489 }
 0x147   : > { %v644_v38 = vsel %vm642_vm11, %v641_v34, %v492_v36  ;;  %v643_v39 = vsel %vm642_vm11, %v640_v35, %v490_v37  ;;  %v689_v35 = vsub.f32 %v1846_v25, %v1788_v9 }
 0x149   : > { %v701_v9 = vmul.f32 %v689_v35, %v1796_v14 }
 0x14a   : > { %v498_v40 = vpop.xlane.xlu1 %497  ;;  %v496_v44 = vpop.xlane.xlu0 %495 }
 0x14b   : > { %v647_v24 = vsel %vm645_vm12, %v644_v38, %v498_v40  ;;  %v646_v45 = vsel %vm645_vm12, %v643_v39, %v496_v44 }
 0x14e   : > { %v504_v46 = vpop.xlane.xlu1 %503  ;;  %v502_v47 = vpop.xlane.xlu0 %501 }
 0x14f   : > { %v650_v48 = vsel %vm648_vm13, %v647_v24, %v504_v46  ;;  %v649_v49 = vsel %vm648_vm13, %v646_v45, %v502_v47  ;;  %v692_v24 = vmul.f32 %v690_v32, %v690_v32  ;;  %v691_v45 = vmul.f32 %v689_v35, %v689_v35 }
 0x151   : > { %v694_v46 = vmul.f32 -0.61728394, %v692_v24  ;;  %v693_v47 = vmul.f32 -0.61728394, %v691_v45 }
 0x152   : > { %v510_v50 = vpop.xlane.xlu1 %509  ;;  %v508_v51 = vpop.xlane.xlu0 %507 }
 0x153   : > { %v653_v52 = vsel %vm651_vm14, %v650_v48, %v510_v50  ;;  %v652_v54 = vsel %vm651_vm14, %v649_v49, %v508_v51  ;;  %v697_v48 = vmul.f32 1.442695, %v694_v46  ;;  %v695_v49 = vmul.f32 1.442695, %v693_v47 }
 0x154   : > { %v703_v50 = vmul.f32 1.442695, %v701_v9  ;;  %v702_v51 = vmul.f32 %v690_v32, %v1796_v14 }
 0x155   : > { %1343 = vpow2.f32 %v697_v48 }
 0x156   : > { %v516_v55 = vpop.xlane.xlu1 %515  ;;  %v514_v56 = vpop.xlane.xlu0 %513  ;;  %1345 = vpow2.f32 %v695_v49 }
 0x157   : > { %v656_v58 = vsel %vm654_vm15, %v653_v52, %v516_v55  ;;  %v655_v59 = vsel %vm654_vm15, %v652_v54, %v514_v56  ;;  %1347 = vpow2.f32 %v703_v50  ;;  %v705_v52 = vmul.f32 1.442695, %v702_v51 }
 0x158   : > { %v737_v54 = vsub.f32 %v1846_v25, %v1784_v6 }
 0x159   : > { %1349 = vpow2.f32 %v705_v52 }
 0x15a   : > { %v541_v60 = vpop.xlane.xlu1 %540  ;;  %v539_v61 = vpop.xlane.xlu0 %538  ;;  %v739_v55 = vmul.f32 %v737_v54, %v737_v54 }
 0x15b   : > { %v1901_v62 = vsel %vm2106_vm0, %v656_v58, %v541_v60  ;;  %v1904_v63 = vsel %vm2106_vm0, %v655_v59, %v539_v61  ;;  %v738_v58 = vsub.f32 %v1842_v21, %v1784_v6  ;;  %vm684_vm0 = vcmask 130048  }
 0x15c   : > { %v741_v61 = vmul.f32 -0.61728394, %v739_v55 }
 0x15e   : > { %v547_v0 = vpop.xlane.xlu1 %546  ;;  %v545_v1 = vpop.xlane.xlu0 %544 }
 0x15f   : > { %v1344_v56 = vpop.eup %1343 }
 0x160   : > { %v1346_v59 = vpop.eup %1345 }
 0x161   : > { %v1348_v60 = vpop.eup %1347 }
 0x162   : > { %v553_v2 = vpop.xlane.xlu1 %552  ;;  %v551_v5 = vpop.xlane.xlu0 %550 }
 0x163   : > { %v661_v17 = vsel %vm615_vm2, %v547_v0, %v553_v2  ;;  %v660_v19 = vsel %vm615_vm2, %v545_v1, %v551_v5  ;;  %v749_v0 = vmul.f32 %v737_v54, %v1796_v14  ;;  %v740_v1 = vmul.f32 %v738_v58, %v738_v58 }
 0x164   : > { %v700_v2 = vmul.f32 %v1344_v56, %v1803_v42  ;;  %v699_v5 = vmul.f32 %v1346_v59, %v1806_v43 }
 0x166   : > { %v559_v7 = vpop.xlane.xlu1 %558  ;;  %v557_v8 = vpop.xlane.xlu0 %556 }
 0x167   : > { %v663_v20 = vsel %vm618_vm3, %v661_v17, %v559_v7  ;;  %v662_v22 = vsel %vm618_vm3, %v660_v19, %v557_v8  ;;  %v707_v7 = vmin.f32 %v1348_v60, 1e+30  ;;  %v1350_v8 = vpop.eup %1349  ;;  %v785_v19 = vsub.f32 %v1846_v25, %v1811_v53 }
 0x168   : > { %v708_v6 = vmin.f32 %v1350_v8, 1e+30 }
 0x16a   : > { %v565_v3 = vpop.xlane.xlu1 %564  ;;  %v563_v10 = vpop.xlane.xlu0 %562  ;;  %v714_v17 = vmul.f32 %v708_v6, %v700_v2 }
 0x16b   : > { %v665_v23 = vsel %vm621_vm4, %v663_v20, %v565_v3  ;;  %v664_v26 = vsel %vm621_vm4, %v662_v22, %v563_v10  ;;  %v743_v3 = vmul.f32 1.442695, %v741_v61  ;;  %v751_v10 = vmul.f32 1.442695, %v749_v0 }
 0x16c   : > { %v720_v22 = vmul.f32 %v714_v17, %v708_v6 }
 0x16d   : > { %1351 = vpow2.f32 %v743_v3 }
 0x16e   : > { %v590_v11 = vpop.xlane.xlu1 %589  ;;  %v588_v12 = vpop.xlane.xlu0 %587  ;;  %1353 = vpow2.f32 %v751_v10 }
 0x16f   : > { %v667_v28 = vsel %vm624_vm5, %v665_v23, %v590_v11  ;;  %v666_v29 = vsel %vm624_vm5, %v664_v26, %v588_v12  ;;  %v742_v11 = vmul.f32 -0.61728394, %v740_v1  ;;  %v713_v12 = vmul.f32 %v707_v7, %v699_v5 }
 0x170   : > { %v787_v23 = vmul.f32 %v785_v19, %v785_v19  ;;  %v786_v26 = vsub.f32 %v1842_v21, %v1811_v53 }
 0x172   : > { %v596_v4 = vpop.xlane.xlu1 %595  ;;  %v594_v13 = vpop.xlane.xlu0 %593  ;;  %v788_v32 = vmul.f32 %v786_v26, %v786_v26 }
 0x173   : > { %v669_v30 = vsel %vm627_vm6, %v667_v28, %v596_v4  ;;  %v668_v31 = vsel %vm627_vm6, %v666_v29, %v594_v13  ;;  %v750_v4 = vmul.f32 %v738_v58, %v1796_v14  ;;  %v745_v13 = vmul.f32 1.442695, %v742_v11 }
 0x174   : > { %v726_v29 = vmul.f32 %v720_v22, %v708_v6 }
 0x175   : > { %1355 = vpow2.f32 %v745_v13 }
 0x176   : > { %v602_v57 = vpop.xlane.xlu1 %601  ;;  %v600_v16 = vpop.xlane.xlu0 %599 }
 0x177   : > { %v671_v33 = vsel %vm630_vm7, %v669_v30, %v602_v57  ;;  %v670_v34 = vsel %vm630_vm7, %v668_v31, %v600_v16  ;;  %v719_v57 = vmul.f32 %v713_v12, %v707_v7  ;;  %v753_v16 = vmul.f32 1.442695, %v750_v4 }
 0x178   : > { %v789_v30 = vmul.f32 -0.61728394, %v787_v23  ;;  %v797_v31 = vmul.f32 %v785_v19, %v1796_v14 }
 0x179   : > { %v725_v20 = vmul.f32 %v719_v57, %v707_v7  ;;  %1357 = vpow2.f32 %v753_v16 }
 0x17a   : > { %v608_v27 = vpop.xlane.xlu1 %607  ;;  %v606_v41 = vpop.xlane.xlu0 %605  ;;  %v799_v53 = vmul.f32 1.442695, %v797_v31 }
 0x17b   : > { %v673_v36 = vsel %vm633_vm8, %v671_v33, %v608_v27  ;;  %v672_v37 = vsel %vm633_vm8, %v670_v34, %v606_v41  ;;  %v1352_v27 = vpop.eup %1351  ;;  %v731_v41 = vmul.f32 %v725_v20, %v707_v7 }
 0x17c   : > { %v1354_v28 = vpop.eup %1353  ;;  %v747_v33 = vmul.f32 %v1352_v27, %v1806_v43 }
 0x17d   : > { %v755_v34 = vmin.f32 %v1354_v28, 1e+30 }
 0x17e   : > { %v614_v38 = vpop.xlane.xlu1 %613  ;;  %v612_v39 = vpop.xlane.xlu0 %611 }
 0x17f   : > { %v675_v40 = vsel %vm636_vm9, %v673_v36, %v614_v38  ;;  %v674_v44 = vsel %vm636_vm9, %v672_v37, %v612_v39  ;;  %v1356_v35 = vpop.eup %1355  ;;  %v732_v36 = vmul.f32 %v726_v29, %v708_v6  ;;  %v791_v38 = vmul.f32 1.442695, %v789_v30 }
 0x180   : > { %680 = vrot.lane.b32.xlu1 %v675_v40, %s1541_s6  ;;  %678 = vrot.lane.b32.xlu0 %v674_v44, %s1541_s6  ;;  %v790_v39 = vmul.f32 -0.61728394, %v788_v32  ;;  %v761_v40 = vmul.f32 %v755_v34, %v747_v33  ;;  %v798_v44 = vmul.f32 %v786_v26, %v1796_v14  ;;  %v748_v24 = vmul.f32 %v1356_v35, %v1803_v42 }
 0x181   : > { %1359 = vpow2.f32 %v791_v38 }
 0x182   : > { %1361 = vpow2.f32 %v799_v53  ;;  %v793_v46 = vmul.f32 1.442695, %v790_v39  ;;  %v767_v47 = vmul.f32 %v761_v40, %v755_v34  ;;  %v801_v9 = vmul.f32 1.442695, %v798_v44  ;;  %v862_v51 = vpop.xlane.xlu1 %861  ;;  %v860_v14 = vpop.xlane.xlu0 %859  ;;  %v1367_v44 = vld [vmem:[%s1765_s1] sm:$0xff] }
 0x183   : > { %v1358_v37 = vpop.eup %1357 }
 0x184   : > { %v756_v45 = vmin.f32 %v1358_v37, 1e+30  ;;  %1363 = vpow2.f32 %v793_v46  ;;  %v773_v49 = vmul.f32 %v767_v47, %v755_v34 }
 0x185   : > { %1365 = vpow2.f32 %v801_v9 }
 0x186   : > { %v762_v48 = vmul.f32 %v756_v45, %v748_v24  ;;  %v779_v54 = vmul.f32 %v773_v49, %v755_v34  ;;  %v868_v58 = vpop.xlane.xlu1 %867  ;;  %v866_v60 = vpop.xlane.xlu0 %865 }
 0x188   : > { %v768_v50 = vmul.f32 %v762_v48, %v756_v45 }
 0x18a   : > { %v774_v56 = vmul.f32 %v768_v50, %v756_v45  ;;  %v874_v3 = vpop.xlane.xlu1 %873  ;;  %v872_v10 = vpop.xlane.xlu0 %871 }
 0x18b   : > { %v1360_v52 = vpop.eup %1359 }
 0x18c   : > { %v1362_v55 = vpop.eup %1361  ;;  %v795_v59 = vmul.f32 %v1360_v52, %v1806_v43  ;;  %v780_v1 = vmul.f32 %v774_v56, %v756_v45  ;;  %v1368_v45 = vld [vmem:[%s1765_s1 + $0x8] sm:$0xff]  ;;  %s1028_s1 = sshll.u32 %s291_s29, 4  ;;  %s2004_s1 = int_to_ptr.vmem [resolvable:$true] %s1028_s1 }
 0x18d   : > { %v803_v61 = vmin.f32 %v1362_v55, 1e+30  ;;  %v352_v46 = vsub.f32 %v1368_v45, %v1842_v21  ;;  %s1442_s14 = scalar_lea.vmem %s2004_s1, 256  ;;  %p1449_p11 = scmp.lt.s32.totalorder %s2004_s1, %s1447_s8 }
 0x18e   : > { %v1364_v0 = vpop.eup %1363  ;;  %v880_v4 = vpop.xlane.xlu1 %879  ;;  %p1443_p8 = scmp.ne.s32.totalorder %s2004_s1, %s1442_s14  ;;  %p1450_p5 = scmp.lt.s32.totalorder %s1448_s12, %s1442_s14 }
 0x18f   : > { %v796_v7 = vmul.f32 %v1364_v0, %v1803_v42  ;;  %v878_v43 = vpop.xlane.xlu0 %877 }
 0x190   : > { %p1444_p2 = pnand %p1443_p8, %p2122_p12  ;;  %p1451_p3 = por %p1450_p5, %p1449_p11 }
 0x192   : > { %p1445_p10 = pneg %p1444_p2 }
 0x193   : > { %v902_v19 = vpop.xlane.xlu0 %901 }
 0x194   : > { %p1452_p7 = pnand %p1451_p3, %p1445_p10 }
 0x197   : > { %v908_v26 = vpop.xlane.xlu0 %907 }
 0x19b   : > { %v914_v31 = vpop.xlane.xlu0 %913 }
 0x19f   : > { %711 = vadd.xlane.f32.xlu0 %v700_v2  ;;  %v1366_v2 = vpop.eup %1365 }
 0x1a0   : > { %v804_v8 = vmin.f32 %v1366_v2, 1e+30 }
 0x1a3   : > { %715 = vadd.xlane.f32.xlu0 %v713_v12  ;;  %v810_v12 = vmul.f32 %v804_v8, %v796_v7 }
 0x1a4   : > { %709 = vadd.xlane.f32.xlu1 %v699_v5  ;;  %v809_v5 = vmul.f32 %v803_v61, %v795_v59 }
 0x1a5   : > { %v816_v13 = vmul.f32 %v810_v12, %v804_v8 }
 0x1a6   : > { %v815_v11 = vmul.f32 %v809_v5, %v803_v61 }
 0x1a7   : > { %721 = vadd.xlane.f32.xlu0 %v719_v57  ;;  %v822_v16 = vmul.f32 %v816_v13, %v804_v8 }
 0x1a8   : > { %717 = vadd.xlane.f32.xlu1 %v714_v17  ;;  %v821_v6 = vmul.f32 %v815_v11, %v803_v61  ;;  %v904_v17 = vpop.xlane.xlu1 %903 }
 0x1a9   : > { %v828_v42 = vmul.f32 %v822_v16, %v804_v8 }
 0x1aa   : > { %v827_v57 = vmul.f32 %v821_v6, %v803_v61 }
 0x1ab   : > { %727 = vadd.xlane.f32.xlu0 %v725_v20  ;;  %v960_v20 = vsel %vm615_vm2, %v862_v51, %v868_v58 }
 0x1ac   : > { %723 = vadd.xlane.f32.xlu1 %v720_v22  ;;  %v959_v22 = vsel %vm615_vm2, %v860_v14, %v866_v60  ;;  %v910_v23 = vpop.xlane.xlu1 %909  ;;  %v962_v27 = vsel %vm618_vm3, %v960_v20, %v874_v3 }
 0x1ad   : > { %v964_v28 = vsel %vm621_vm4, %v962_v27, %v880_v4 }
 0x1ae   : > { %v966_v32 = vsel %vm624_vm5, %v964_v28, %v904_v17 }
 0x1af   : > { %733 = vadd.xlane.f32.xlu0 %v731_v41  ;;  %v961_v41 = vsel %vm618_vm3, %v959_v22, %v872_v10 }
 0x1b0   : > { %729 = vadd.xlane.f32.xlu1 %v726_v29  ;;  %v963_v29 = vsel %vm621_vm4, %v961_v41, %v878_v43  ;;  %v916_v30 = vpop.xlane.xlu1 %915 }
 0x1b3   : > { %757 = vadd.xlane.f32.xlu0 %v747_v33  ;;  %v965_v33 = vsel %vm624_vm5, %v963_v29, %v902_v19 }
 0x1b4   : > { %735 = vadd.xlane.f32.xlu1 %v732_v36  ;;  %v967_v34 = vsel %vm627_vm6, %v965_v33, %v908_v26  ;;  %v922_v35 = vpop.xlane.xlu1 %921  ;;  %v920_v36 = vpop.xlane.xlu0 %919 }
 0x1b5   : > { %v969_v37 = vsel %vm630_vm7, %v967_v34, %v914_v31 }
 0x1b6   : > { %v971_v53 = vsel %vm633_vm8, %v969_v37, %v920_v36 }
 0x1b7   : > { %763 = vadd.xlane.f32.xlu0 %v761_v40 }
 0x1b8   : > { %759 = vadd.xlane.f32.xlu1 %v748_v24  ;;  %v928_v39 = vpop.xlane.xlu1 %927  ;;  %v926_v40 = vpop.xlane.xlu0 %925  ;;  %v351_v24 = vsub.f32 %v1367_v44, %v1846_v25  ;;  %v987_v25 = vld [vmem:[%s1911_s9] sm:$0xff] }
 0x1b9   : > { %v973_v9 = vsel %vm636_vm9, %v971_v53, %v926_v40 }
 0x1bb   : > { %769 = vadd.xlane.f32.xlu0 %v767_v47 }
 0x1bc   : > { %765 = vadd.xlane.f32.xlu1 %v762_v48  ;;  %v353_v48 = vmul.f32 %v351_v24, %v351_v24 }
 0x1be   : > { %1004 = vst [vmem:[%s291_s29] sm:$0xff] %v353_v48 }
 0x1bf   : > { %775 = vadd.xlane.f32.xlu0 %v773_v49  ;;  %v354_v49 = vmul.f32 %v352_v46, %v352_v46 }
 0x1c0   : > { %771 = vadd.xlane.f32.xlu1 %v768_v50  ;;  %v988_v50 = vld [vmem:[%s1911_s9 + $0x8] sm:$0xff] }
 0x1c1   : > { %1005 = vst [vmem:[%s291_s29 + $0x8] sm:$0xff] %v354_v49 }
 0x1c3   : > { %781 = vadd.xlane.f32.xlu0 %v779_v54 }
 0x1c4   : > { %777 = vadd.xlane.f32.xlu1 %v774_v56 }
 0x1c7   : > { %805 = vadd.xlane.f32.xlu0 %v795_v59 }
 0x1c8   : > { %783 = vadd.xlane.f32.xlu1 %v780_v1 }
 0x1cb   : > { %811 = vadd.xlane.f32.xlu0 %v809_v5 }
 0x1cc   : > { %807 = vadd.xlane.f32.xlu1 %v796_v7 }
 0x1cf   : > { %817 = vadd.xlane.f32.xlu0 %v815_v11 }
 0x1d0   : > { %813 = vadd.xlane.f32.xlu1 %v810_v12 }
 0x1d3   : > { %823 = vadd.xlane.f32.xlu0 %v821_v6 }
 0x1d4   : > { %819 = vadd.xlane.f32.xlu1 %v816_v13 }
 0x1d7   : > { %829 = vadd.xlane.f32.xlu0 %v827_v57 }
 0x1d8   : > { %825 = vadd.xlane.f32.xlu1 %v822_v16 }
 0x1db   : > { %853 = vadd.xlane.f32.xlu0 %v1866_v18  ;;  %v968_v18 = vsel %vm627_vm6, %v966_v32, %v910_v23 }
 0x1dc   : > { %831 = vadd.xlane.f32.xlu1 %v828_v42 }
 0x1e0   : > { %855 = vadd.xlane.f32.xlu1 %v1862_v15  ;;  %v970_v15 = vsel %vm630_vm7, %v968_v18, %v916_v30 }
 0x1e1   : > { %v972_v38 = vsel %vm633_vm8, %v970_v15, %v922_v35 }
 0x1e2   : > { %v974_v47 = vsel %vm636_vm9, %v972_v38, %v928_v39 }
 0x1f1   : > { %979 = vrot.lane.b32.xlu1 %v974_v47, %s1541_s6  ;;  %977 = vrot.lane.b32.xlu0 %v973_v9, %s1541_s6 }
 0x1f2   : > { %v681_v51 = vpop.permute.xlu1 %680  ;;  %v679_v14 = vpop.permute.xlu0 %678 }
 0x1f3   : > { %v686_v21 = vsel %vm684_vm0, %v1901_v62, %v681_v51  ;;  %v685_v52 = vsel %vm684_vm0, %v1904_v63, %v679_v14 }
 0x1f4   : > { %v992_v54 = vadd.f32 %v988_v50, %v686_v21  ;;  %v991_v55 = vadd.f32 %v987_v25, %v685_v52 }
 0x1f6   : > { %997 = vst.msk [vmem:[%s1911_s9 + $0x8] sm:$0xff] %vm303_vm1, %v992_v54  ;;  %996 = vst.msk [vmem:[%s1911_s9] sm:$0xff] %vm303_vm1, %v991_v55 }
 0x1f7   : > { %1455 = shalt.err (!%p1452_p7)
}
 0x1f8   : > { %s1456_s25 = scalar_lea.hbm %s2002_s5, 256  ;;  %s1460_s7 = scalar_lea.hbm %s2099_s4, 512 }
 0x1f9   : > { %p1457_p6 = scmp.ne.s32.totalorder %s2002_s5, %s1456_s25  ;;  %p1461_p0 = scmp.lt.u32.totalorder %s2002_s5, %s2099_s4 }
 0x1fa   : > { %p1462_p4 = scmp.lt.u32.totalorder %s1460_s7, %s1456_s25  ;;  %p1464_p8 = scmp.lt.u32.totalorder %s1456_s25, %s2002_s5 }
 0x1fb   : > { %p1458_p1 = pnand %p1457_p6, %p2122_p12 }
 0x1fc   : > { %p1463_p13 = por %p1462_p4, %p1461_p0 }
 0x1fd   : > { %p1459_p9 = pneg %p1458_p1 }
 0x1fe   : > { %p1465_p2 = por %p1464_p8, %p1463_p13 }
 0x200   : > { %p1466_p10 = pnand %p1465_p2, %p1459_p9 }
 0x202   : > { %1469 = shalt.err (!%p1466_p10)
}
 0x203   : > { %s1543_s0 = smov 128   ;;  %s1544_s6 = smov 8   ;;  %v989_v48 = vld [vmem:[%s1911_s9 + $0x10] sm:$0xff] }
 0x204   : > { %1210 = dma.vmem_to_hbm [thread:$0]  (%p2122_p12), %s2004_s1, 256, %s2002_s5, %s1012_s18, %s1543_s0, %s1543_s0, %s1544_s6  }
 0x22c   : > { %v712_v62 = vpop.xlane.xlu0 %711 }
 0x230   : > { %v716_v63 = vpop.xlane.xlu0 %715 }
 0x231   : > { %v710_v56 = vpop.xlane.xlu1 %709 }
 0x232   : > { %v929_v42 = vsel %vm615_vm2, %v710_v56, %v716_v63  ;;  %v990_v63 = vld [vmem:[%s1911_s9 + $0x18] sm:$0xff] }
 0x234   : > { %v722_v58 = vpop.xlane.xlu0 %721 }
 0x235   : > { %v718_v59 = vpop.xlane.xlu1 %717  ;;  %v931_v20 = vsel %vm618_vm3, %v929_v42, %v722_v58 }
 0x236   : > { %v930_v28 = vsel %vm615_vm2, %v712_v62, %v718_v59  ;;  %vm2123_vm2 = vcmask 121856  }
 0x238   : > { %v728_v60 = vpop.xlane.xlu0 %727 }
 0x239   : > { %v724_v61 = vpop.xlane.xlu1 %723  ;;  %v933_v22 = vsel %vm621_vm4, %v931_v20, %v728_v60 }
 0x23a   : > { %v932_v30 = vsel %vm618_vm3, %v930_v28, %v724_v61  ;;  %vm2124_vm3 = vmmov %vm2123_vm2 }
 0x23c   : > { %v734_v0 = vpop.xlane.xlu0 %733 }
 0x23d   : > { %v730_v1 = vpop.xlane.xlu1 %729  ;;  %v935_v26 = vsel %vm624_vm5, %v933_v22, %v734_v0 }
 0x23e   : > { %v934_v33 = vsel %vm621_vm4, %v932_v30, %v730_v1 }
 0x240   : > { %v758_v2 = vpop.xlane.xlu0 %757 }
 0x241   : > { %v736_v5 = vpop.xlane.xlu1 %735  ;;  %v937_v41 = vsel %vm627_vm6, %v935_v26, %v758_v2 }
 0x242   : > { %v936_v35 = vsel %vm624_vm5, %v934_v33, %v736_v5 }
 0x244   : > { %v764_v7 = vpop.xlane.xlu0 %763 }
 0x245   : > { %v760_v8 = vpop.xlane.xlu1 %759  ;;  %v939_v29 = vsel %vm630_vm7, %v937_v41, %v764_v7 }
 0x246   : > { %v938_v15 = vsel %vm627_vm6, %v936_v35, %v760_v8 }
 0x248   : > { %v770_v3 = vpop.xlane.xlu0 %769 }
 0x249   : > { %v766_v10 = vpop.xlane.xlu1 %765  ;;  %v941_v31 = vsel %vm633_vm8, %v939_v29, %v770_v3 }
 0x24a   : > { %v940_v38 = vsel %vm630_vm7, %v938_v15, %v766_v10 }
 0x24c   : > { %v776_v11 = vpop.xlane.xlu0 %775 }
 0x24d   : > { %v772_v12 = vpop.xlane.xlu1 %771  ;;  %v943_v18 = vsel %vm636_vm9, %v941_v31, %v776_v11 }
 0x24e   : > { %v942_v40 = vsel %vm633_vm8, %v940_v38, %v772_v12 }
 0x250   : > { %v782_v4 = vpop.xlane.xlu0 %781 }
 0x251   : > { %v778_v43 = vpop.xlane.xlu1 %777  ;;  %v945_v36 = vsel %vm639_vm10, %v943_v18, %v782_v4 }
 0x252   : > { %v944_v45 = vsel %vm636_vm9, %v942_v40, %v778_v43 }
 0x254   : > { %v806_v6 = vpop.xlane.xlu0 %805 }
 0x255   : > { %v784_v13 = vpop.xlane.xlu1 %783  ;;  %v947_v37 = vsel %vm642_vm11, %v945_v36, %v806_v6 }
 0x256   : > { %v946_v47 = vsel %vm639_vm10, %v944_v45, %v784_v13 }
 0x258   : > { %v812_v57 = vpop.xlane.xlu0 %811 }
 0x259   : > { %v808_v16 = vpop.xlane.xlu1 %807  ;;  %v949_v53 = vsel %vm645_vm12, %v947_v37, %v812_v57 }
 0x25a   : > { %v948_v49 = vsel %vm642_vm11, %v946_v47, %v808_v16 }
 0x25c   : > { %v818_v17 = vpop.xlane.xlu0 %817 }
 0x25d   : > { %v814_v19 = vpop.xlane.xlu1 %813  ;;  %v951_v44 = vsel %vm648_vm13, %v949_v53, %v818_v17 }
 0x25e   : > { %v950_v51 = vsel %vm645_vm12, %v948_v49, %v814_v19 }
 0x260   : > { %v824_v23 = vpop.xlane.xlu0 %823 }
 0x261   : > { %v820_v27 = vpop.xlane.xlu1 %819  ;;  %v953_v46 = vsel %vm651_vm14, %v951_v44, %v824_v23 }
 0x262   : > { %v952_v52 = vsel %vm648_vm13, %v950_v51, %v820_v27 }
 0x264   : > { %v830_v32 = vpop.xlane.xlu0 %829 }
 0x265   : > { %v826_v34 = vpop.xlane.xlu1 %825  ;;  %v955_v9 = vsel %vm654_vm15, %v953_v46, %v830_v32 }
 0x266   : > { %v954_v55 = vsel %vm651_vm14, %v952_v52, %v826_v34 }
 0x268   : > { %v854_v39 = vpop.xlane.xlu0 %853 }
 0x269   : > { %v832_v24 = vpop.xlane.xlu1 %831  ;;  %v957_v50 = vsel %vm2123_vm2, %v955_v9, %v854_v39 }
 0x26a   : > { %v956_v62 = vsel %vm654_vm15, %v954_v55, %v832_v24 }
 0x26c   : > { %v978_v25 = vpop.permute.xlu0 %977 }
 0x26d   : > { %v983_v14 = vsel %vm684_vm0, %v957_v50, %v978_v25  ;;  %v856_v21 = vpop.xlane.xlu1 %855 }
 0x26e   : > { %v993_v54 = vadd.f32 %v989_v48, %v983_v14  ;;  %v958_v56 = vsel %vm2124_vm3, %v956_v62, %v856_v21 }
 0x270   : > { %998 = vst.msk [vmem:[%s1911_s9 + $0x10] sm:$0xff] %vm303_vm1, %v993_v54 }
 0x271   : > { %v980_v58 = vpop.permute.xlu1 %979 }
 0x272   : > { %v984_v59 = vsel %vm684_vm0, %v958_v56, %v980_v58 }
 0x273   : > { %v994_v60 = vadd.f32 %v990_v63, %v984_v59 }
 0x275   : > { %999 = vst.msk [vmem:[%s1911_s9 + $0x18] sm:$0xff] %vm303_vm1, %v994_v60 }
 0x276 PF: > { %s1051_s26 = sand.u32 1, %s1512_s15   ;;  %p2125_p12 = scmp.ne.s32.totalorder %s2112_s27, 0 }
 0x277   : > { %p2126_p11 = scmp.ge.s32.totalorder %s1532_s20, 2  ;;  %s1052_s30 = scalar_lea.sflag [#allocation4], %s1051_s26 }
 0x279   : > { %p1224_p5 = pnand %p2126_p11, %p2125_p12 }
 0x27b   : > { %1507 = dma.done.wait (!%p1224_p5), %s1052_s30, 256  }
 0x27c   : > { %1509 = vsyncadd (!%p1224_p5), %s1052_s30, 4294967040  ;;  %s25_s20 = sadd.s32 1, %s1532_s20   ;;  %s2127_s11 = sld [smem:[#allocation15_spill]] }
 0x27d   : > { %p22_p3 = scmp.ge.s32.totalorder %s25_s20, 4   ;;  %s2128_s29 = sld [smem:[#allocation14_spill]] }
 0x27e   : > { %s2129_s15 = smov %s1516_s16  ;;  %s2130_s16 = smov %s1520_s17 }
 0x27f   : > { %s2132_s18 = smov %s1528_s19  ;;  %24 = sbr.rel (!%p22_p3) target bundleno = 12 (0xc), region = 111 }
 0x282   : > { %s2131_s17 = smov %s2127_s11 }
 0x283   : > { %s2133_s19 = smov %s2128_s29 }
 0x286   :  { %1057 = vsyncpa [#allocation3], 1 }
 0x287   :  { %1059 = vsyncpa [#allocation3 + $0x1], 1 }
 0x288   :  { %1060 = vsyncpa [#allocation8], 1 }
 0x289   :  { %1062 = vsyncpa [#allocation8 + $0x1], 1 }
 0x28a   :  { %1063 = vsyncpa [#allocation4], 1 }
 0x28b   :  { %1065 = vsyncpa [#allocation4 + $0x1], 1 }
 0x28c   :  { %1066 = vsyncpa [#allocation5], 1 }
 0x28d   :  { %1068 = vsyncpa [#allocation5 + $0x1], 1 }

</bundles_post_ra>
